<compile_context>
chip_gen: v7x
topology: tpu7x:2x2x1
jax: 0.10.0
libtpu: 0.0.40
codegen_flags: <defaults>
</compile_context>

<pallas_src>
import functools
import math

import jax
import jax.numpy as jnp
from jax.experimental import pallas as pl
from jax.experimental.pallas import tpu as pltpu


# Comfortably above what any tile here needs, and safe on v7x (64 MiB physical,
# 32 MiB scoped default); v5e/v6e (128 MiB) could go higher for bigger tiles.
_VMEM_LIMIT_BYTES = 32 * 1024 * 1024


def _round_up(x, m):
    return ((x + m - 1) // m) * m


def _conv_dims(h, w):
    """Static geometry of the 8/4 -> 4/2 -> 3/1 valid-conv chain.

    Flat "row" indexing keeps the space-to-depth grid width ws1 as the row
    stride through the whole chain, so every tap gather is a contiguous or
    stride-2 slice (junk rows are never read by valid outputs and are dropped
    implicitly by the downstream slices / the final flatten).
    """
    oh1, ow1 = (h - 8) // 4 + 1, (w - 8) // 4 + 1
    oh2, ow2 = (oh1 - 4) // 2 + 1, (ow1 - 4) // 2 + 1
    oh3, ow3 = oh2 - 2, ow2 - 2
    assert oh1 > 0 and ow1 > 0 and oh2 > 0 and ow2 > 0 and oh3 > 0 and ow3 > 0, \
        "image too small for the conv chain"
    hs1, ws1 = _round_up(h, 4) // 4, _round_up(w, 4) // 4   # space-to-depth grid
    l_h1 = (hs1 - 2) * ws1 + (ws1 - 1)   # conv1 flat output rows (row stride ws1)
    m2 = (oh2 - 1) * ws1 + ow2           # conv2 flat output rows
    m3 = (oh3 - 1) * ws1 + ow3           # conv3 flat output rows
    return dict(oh1=oh1, ow1=ow1, oh2=oh2, ow2=ow2, oh3=oh3, ow3=ow3,
                hs1=hs1, ws1=ws1, l_h1=l_h1, m2=m2, m3=m3,
                feat=64 * oh3 * ow3)


# ----------------------------------------------------------------------------
# The fused kernel: conv1 -> conv2 -> conv3 -> flatten -> FC1 -> FC2
# ----------------------------------------------------------------------------
def _policy_fused_kernel(x_ref, w1_ref, b1_ref, w2_ref, b2_ref, w3_ref, b3_ref,
                         w4_ref, b4_ref, w5_ref, b5_ref, o_ref, h1_ref,
                         *, ws1, l_h1, m2, m3, oh3, ow3):
    bt = x_ref.shape[0]

    def mm_bias(x3, w_ref, b_ref):
        # (bt, M, K) @ (K, N) + bias -> (bt, M, N) f32; samples stacked along M.
        _, m, k = x3.shape
        y = jnp.dot(x3.reshape(bt * m, k), w_ref[...],
                    preferred_element_type=jnp.float32) + b_ref[...]
        return y.reshape(bt, m, y.shape[-1])

    # --- conv1 (k=8, s=4): stride-1 kt=2 conv over the space-to-depth input.
    # The 4 taps are concatenated along K -> one matmul with K = 4*16*C_in.
    xc1 = jnp.concatenate(
        [x_ref[:, d * ws1 + j: d * ws1 + j + l_h1, :]
         for d in range(2) for j in range(2)], axis=-1)
    h1 = jnp.maximum(mm_bias(xc1, w1_ref, b1_ref), 0.0)
    h1_ref[...] = h1            # f32 VMEM scratch for conv2's strided tap reads

    # --- conv2 (k=4, s=2): output flat row r2 = oh2*ws1 + ow2 reads conv1 flat
    # rows 2*r2 + (d*ws1 + j).  16 taps gathered with stride-2 reads and
    # concatenated along K -> one matmul with K = 16*32 = 512.
    xc2 = jnp.concatenate(
        [h1_ref[:, pl.ds(d * ws1 + j, m2, stride=2), :]
         for d in range(4) for j in range(4)], axis=-1).astype(jnp.bfloat16)
    h2 = jnp.maximum(mm_bias(xc2, w2_ref, b2_ref), 0.0).astype(jnp.bfloat16)

    # --- conv3 (k=3, s=1): 9 contiguous tap slices of the in-register conv2
    # output, concatenated along K -> one matmul with K = 9*64 = 576.
    xc3 = jnp.concatenate(
        [h2[:, d * ws1 + j: d * ws1 + j + m3, :]
         for d in range(3) for j in range(3)], axis=-1)
    h3 = jnp.maximum(mm_bias(xc3, w3_ref, b3_ref), 0.0)

    # --- flatten the valid (oh3, ow3) rows in NHWC order (w4 rows match).
    rows = [h3[:, r * ws1: r * ws1 + ow3, :] for r in range(oh3)]
    f3 = rows[0] if oh3 == 1 else jnp.concatenate(rows, axis=1)
    feat = f3.reshape(bt, oh3 * ow3 * 64).astype(jnp.bfloat16)

    # --- FC head: Linear(feat, 512) + ReLU + Linear(512, Npad).  h4 stays in
    # registers; the logits store is a 128-lane (unmasked) tile.
    h4 = jnp.maximum(
        jnp.dot(feat, w4_ref[...], preferred_element_type=jnp.float32)
        + b4_ref[...], 0.0)
    out = jnp.dot(h4.astype(jnp.bfloat16), w5_ref[...],
                  preferred_element_type=jnp.float32) + b5_ref[...]
    o_ref[0] = out.astype(o_ref.dtype)


# ----------------------------------------------------------------------------
# Plain-JAX glue (single 1x-traffic reshuffle of the raw input, no FLOPs)
# ----------------------------------------------------------------------------
def _space_to_depth_input(x_nchw):
    """NCHW -> (B, Hs*Ws, 16*C) bf16 space-to-depth (factor 4) input.

    One XLA copy (fused with the NCHW->NHWC relayout); channel order is
    (si*4 + sj)*C + c, matching conv_weight_to_taps(w, 4)."""
    b, c, h, w = x_nchw.shape
    hp, wp = _round_up(h, 4), _round_up(w, 4)
    if (hp, wp) != (h, w):
        x_nchw = jnp.pad(x_nchw, ((0, 0), (0, 0), (0, hp - h), (0, wp - w)))
    hs, ws = hp // 4, wp // 4
    x = x_nchw.reshape(b, c, hs, 4, ws, 4)
    x = jnp.transpose(x, (0, 2, 4, 3, 5, 1))      # (B, hs, ws, si, sj, C)
    return x.reshape(b, hs * ws, 16 * c).astype(jnp.bfloat16)


def _pick_batch_tile(batch):
    # Several samples per grid step (amortize ~0.35us/step overhead, stack
    # samples along matmul M) while keeping >= 2 grid steps so both v7x
    # TensorCores are used; capped so per-step operands stay small in VMEM.
    return max(1, min(16, batch // 2))


# ----------------------------------------------------------------------------
# Forward pass (matches PolicyNet.forward)
# ----------------------------------------------------------------------------
def policy_net_forward(params, x_nchw, *, num_actions):
    batch, _, h, w = x_nchw.shape
    d = _conv_dims(h, w)
    xf = _space_to_depth_input(x_nchw)              # (B, L1, 16*C_in)

    bt = _pick_batch_tile(batch)
    b_pad = _round_up(batch, bt)
    if b_pad != batch:
        xf = jnp.pad(xf, ((0, b_pad - batch), (0, 0), (0, 0)))
    n_tiles = b_pad // bt

    l_x1, c1s = xf.shape[1], xf.shape[2]
    k1 = params["w1"].shape[0]
    k2 = params["w2"].shape[0]
    k3 = params["w3"].shape[0]
    feat = params["w4"].shape[0]
    npad = params["w5p"].shape[1]

    kernel = functools.partial(
        _policy_fused_kernel, ws1=d["ws1"], l_h1=d["l_h1"], m2=d["m2"],
        m3=d["m3"], oh3=d["oh3"], ow3=d["ow3"])

    out = pl.pallas_call(
        kernel,
        out_shape=jax.ShapeDtypeStruct((n_tiles, bt, npad), jnp.float32),
        grid=(n_tiles,),
        in_specs=[
            pl.BlockSpec((bt, l_x1, c1s), lambda i: (i, 0, 0)),   # per-tile input
            # Resident weights/biases: constant index_map -> DMA'd once by the
            # pipeline; footprint << VMEM budget.
            pl.BlockSpec((k1, 32), lambda i: (0, 0)),
            pl.BlockSpec((1, 32), lambda i: (0, 0)),
            pl.BlockSpec((k2, 64), lambda i: (0, 0)),
            pl.BlockSpec((1, 64), lambda i: (0, 0)),
            pl.BlockSpec((k3, 64), lambda i: (0, 0)),
            pl.BlockSpec((1, 64), lambda i: (0, 0)),
            pl.BlockSpec((feat, 512), lambda i: (0, 0)),
            pl.BlockSpec((1, 512), lambda i: (0, 0)),
            pl.BlockSpec((512, npad), lambda i: (0, 0)),
            pl.BlockSpec((1, npad), lambda i: (0, 0)),
        ],
        out_specs=pl.BlockSpec((1, bt, npad), lambda i: (i, 0, 0)),
        scratch_shapes=[pltpu.VMEM((bt, d["l_h1"], 32), jnp.float32)],
        compiler_params=pltpu.CompilerParams(
            dimension_semantics=("parallel",),      # shard batch tiles across TCs
            vmem_limit_bytes=_VMEM_LIMIT_BYTES),
    )(xf, params["w1"], params["b1"], params["w2"], params["b2"],
      params["w3"], params["b3"], params["w4"], params["b4"],
      params["w5p"], params["b5p"])

    logits = out.reshape(b_pad, npad)
    return logits[:batch, :num_actions]


# ----------------------------------------------------------------------------
# Parameter construction (PyTorch layouts -> kernel layouts)
# ----------------------------------------------------------------------------
def xavier_normal(key, shape, fan_in, fan_out, gain):
    std = gain * math.sqrt(2.0 / (fan_in + fan_out))
    return std * jax.random.normal(key, shape, dtype=jnp.float32)


def conv_weight_to_taps(w_oihw, s):
    """PyTorch (Cout, Cin, k, k) -> (kt*kt, s*s*Cin, Cout), kt = k // s, taps
    (di, dj) row-major, channel order (si*s + sj)*Cin + c (matches the
    space-to-depth channel order used for the kernel input)."""
    cout, cin, kh, kw = w_oihw.shape
    kt = kh // s
    w = jnp.transpose(w_oihw, (2, 3, 1, 0))               # (kh, kw, Cin, Cout)
    w = w.reshape(kt, s, kt, s, cin, cout)                 # (di, si, dj, sj, ., .)
    w = jnp.transpose(w, (0, 2, 1, 3, 4, 5))               # (di, dj, si, sj, ., .)
    return w.reshape(kt * kt, s * s * cin, cout)


def init_policy_net_params(key, img_size, num_actions):
    c_in, h, w = img_size
    d = _conv_dims(h, w)
    oh3, ow3, feat = d["oh3"], d["ow3"], d["feat"]
    relu_gain = math.sqrt(2.0)   # nn.init.calculate_gain('relu')

    ks = jax.random.split(key, 5)
    # Conv weights generated in PyTorch OIHW layout, then converted.
    w1_oihw = xavier_normal(ks[0], (32, c_in, 8, 8), c_in * 64, 32 * 64, relu_gain)
    w2_oihw = xavier_normal(ks[1], (64, 32, 4, 4), 32 * 16, 64 * 16, relu_gain)
    w3_oihw = xavier_normal(ks[2], (64, 64, 3, 3), 64 * 9, 64 * 9, relu_gain)

    # pnet1 weight in PyTorch (512, feat) layout with NCHW-flatten columns,
    # permuted once to the kernel's NHWC flatten order.
    w4_t = xavier_normal(ks[3], (512, feat), feat, 512, relu_gain)
    w4 = (w4_t.reshape(512, 64, oh3, ow3).transpose(0, 2, 3, 1)
              .reshape(512, feat).T)

    # pnet2 weight, gain=1.0; padded to 128 output lanes (extra logits sliced off).
    w5_t = xavier_normal(ks[4], (num_actions, 512), 512, num_actions, 1.0)
    npad = max(128, _round_up(num_actions, 128))
    w5p = jnp.zeros((512, npad), jnp.float32).at[:, :num_actions].set(w5_t.T)

    params = {
        # Conv weights in tap-major, K-concatenated 2-D matmul layouts.
        "w1": conv_weight_to_taps(w1_oihw, 4).reshape(-1, 32).astype(jnp.bfloat16),
        "b1": jnp.zeros((1, 32), jnp.float32),
        "w2": conv_weight_to_taps(w2_oihw, 1).reshape(-1, 64).astype(jnp.bfloat16),
        "b2": jnp.zeros((1, 64), jnp.float32),
        "w3": conv_weight_to_taps(w3_oihw, 1).reshape(-1, 64).astype(jnp.bfloat16),
        "b3": jnp.zeros((1, 64), jnp.float32),
        "w4": w4.astype(jnp.bfloat16),
        "b4": jnp.zeros((1, 512), jnp.float32),
        "w5p": w5p.astype(jnp.bfloat16),
        "b5p": jnp.zeros((1, npad), jnp.float32),
        # log_alpha / target_entropy exist in the module but forward() ignores them.
        "log_alpha": jnp.zeros((1,), jnp.float32),
    }
    ref_conv_weights = (w1_oihw, w2_oihw, w3_oihw)          # for the XLA reference
    return params, ref_conv_weights, feat


# ----------------------------------------------------------------------------
# Plain-JAX/XLA reference (same bf16 weights / f32 accumulation) for checking
# ----------------------------------------------------------------------------
def _reference_forward(params, conv_ws_oihw, x_nchw, *, num_actions):
    x = jnp.transpose(x_nchw, (0, 2, 3, 1)).astype(jnp.bfloat16)
    for w_oihw, b, s in ((conv_ws_oihw[0], params["b1"], 4),
                         (conv_ws_oihw[1], params["b2"], 2),
                         (conv_ws_oihw[2], params["b3"], 1)):
        w_hwio = jnp.transpose(w_oihw, (2, 3, 1, 0)).astype(jnp.bfloat16)
        y = jax.lax.conv_general_dilated(
            x, w_hwio, window_strides=(s, s), padding="VALID",
            dimension_numbers=("NHWC", "HWIO", "NHWC"),
            preferred_element_type=jnp.float32)
        x = jnp.maximum(y + b.reshape(1, 1, 1, -1), 0.0).astype(jnp.bfloat16)
    feat = x.reshape(x.shape[0], -1)
    h = jnp.maximum(jnp.dot(feat, params["w4"],
                            preferred_element_type=jnp.float32) + params["b4"], 0.0)
    logits = jnp.dot(h.astype(jnp.bfloat16), params["w5p"],
                     preferred_element_type=jnp.float32) + params["b5p"]
    return logits[:, :num_actions]


if __name__ == "__main__":
    # Smallest spatial size the 8/4 -> 4/2 -> 3/1 conv chain accepts is 36.
    img_size = (4, 36, 36)
    num_actions = 6
    batch = 2

    key = jax.random.PRNGKey(0)
    k_param, k_x = jax.random.split(key)
    params, ref_conv_ws, feat_size = init_policy_net_params(k_param, img_size, num_actions)

    x = jax.random.normal(k_x, (batch,) + img_size, dtype=jnp.float32)

    fwd = jax.jit(functools.partial(policy_net_forward, num_actions=num_actions))
    logits = jax.block_until_ready(fwd(params, x))

    assert logits.shape == (batch, num_actions), logits.shape
    assert bool(jnp.all(jnp.isfinite(logits)))

    # Correctness cross-check against plain XLA with identical bf16 weights.
    ref_fn = jax.jit(functools.partial(_reference_forward, num_actions=num_actions))
    ref = jax.block_until_ready(ref_fn(params, ref_conv_ws, x))
    err = float(jnp.max(jnp.abs(logits - ref)))
    scale = max(1.0, float(jnp.max(jnp.abs(ref))))
    assert err <= 2e-2 * scale, (err, scale)

    print("KERNEL_OK")
</pallas_src>

<mosaic_0001>
module attributes {stable_mosaic.version = 11 : i64} {
  func.func @_policy_fused_kernel(%arg0: i32, %arg1: memref<1x81x64xbf16, #tpu.memory_space<vmem>>, %arg2: memref<256x32xbf16, #tpu.memory_space<vmem>>, %arg3: memref<1x32xf32, #tpu.memory_space<vmem>>, %arg4: memref<512x64xbf16, #tpu.memory_space<vmem>>, %arg5: memref<1x64xf32, #tpu.memory_space<vmem>>, %arg6: memref<576x64xbf16, #tpu.memory_space<vmem>>, %arg7: memref<1x64xf32, #tpu.memory_space<vmem>>, %arg8: memref<64x512xbf16, #tpu.memory_space<vmem>>, %arg9: memref<1x512xf32, #tpu.memory_space<vmem>>, %arg10: memref<512x128xbf16, #tpu.memory_space<vmem>>, %arg11: memref<1x128xf32, #tpu.memory_space<vmem>>, %arg12: memref<1x1x128xf32, #tpu.memory_space<vmem>>, %arg13: memref<1x71x32xf32, #tpu.memory_space<vmem>>) attributes {dimension_semantics = [#tpu.dimension_semantics<parallel>], iteration_bounds = array<i64: 2>, scalar_prefetch = 0 : i64, scratch_operands = 1 : i64, tpu.core_type = #tpu.core_type<tc>, window_params = [{transform_indices = @transform_0, window_bounds = array<i64: 1, 81, 64>}, {pipeline_mode = #tpu.pipeline_mode<synchronous>, transform_indices = @transform_1, window_bounds = array<i64: 256, 32>}, {pipeline_mode = #tpu.pipeline_mode<synchronous>, transform_indices = @transform_2, window_bounds = array<i64: 1, 32>}, {pipeline_mode = #tpu.pipeline_mode<synchronous>, transform_indices = @transform_3, window_bounds = array<i64: 512, 64>}, {pipeline_mode = #tpu.pipeline_mode<synchronous>, transform_indices = @transform_4, window_bounds = array<i64: 1, 64>}, {pipeline_mode = #tpu.pipeline_mode<synchronous>, transform_indices = @transform_5, window_bounds = array<i64: 576, 64>}, {pipeline_mode = #tpu.pipeline_mode<synchronous>, transform_indices = @transform_6, window_bounds = array<i64: 1, 64>}, {pipeline_mode = #tpu.pipeline_mode<synchronous>, transform_indices = @transform_7, window_bounds = array<i64: 64, 512>}, {pipeline_mode = #tpu.pipeline_mode<synchronous>, transform_indices = @transform_8, window_bounds = array<i64: 1, 512>}, {pipeline_mode = #tpu.pipeline_mode<synchronous>, transform_indices = @transform_9, window_bounds = array<i64: 512, 128>}, {pipeline_mode = #tpu.pipeline_mode<synchronous>, transform_indices = @transform_10, window_bounds = array<i64: 1, 128>}, {transform_indices = @transform_11, window_bounds = array<i64: 1, 1, 128>}]} {
    %c0 = arith.constant 0 : index
    %c0_0 = arith.constant 0 : index
    %c0_1 = arith.constant 0 : index
    %0 = vector.load %arg1[%c0, %c0_0, %c0_1] : memref<1x81x64xbf16, #tpu.memory_space<vmem>>, vector<1x71x64xbf16>
    %c0_2 = arith.constant 0 : index
    %c1 = arith.constant 1 : index
    %c0_3 = arith.constant 0 : index
    %1 = vector.load %arg1[%c0_2, %c1, %c0_3] : memref<1x81x64xbf16, #tpu.memory_space<vmem>>, vector<1x71x64xbf16>
    %c0_4 = arith.constant 0 : index
    %c9 = arith.constant 9 : index
    %c0_5 = arith.constant 0 : index
    %2 = vector.load %arg1[%c0_4, %c9, %c0_5] : memref<1x81x64xbf16, #tpu.memory_space<vmem>>, vector<1x71x64xbf16>
    %c0_6 = arith.constant 0 : index
    %c10 = arith.constant 10 : index
    %c0_7 = arith.constant 0 : index
    %3 = vector.load %arg1[%c0_6, %c10, %c0_7] : memref<1x81x64xbf16, #tpu.memory_space<vmem>>, vector<1x71x64xbf16>
    %4 = tpu.concatenate %0, %1, %2, %3 in 2 : vector<1x71x64xbf16>, vector<1x71x64xbf16>, vector<1x71x64xbf16>, vector<1x71x64xbf16> -> vector<1x71x256xbf16>
    %5 = vector.shape_cast %4 : vector<1x71x256xbf16> to vector<71x256xbf16>
    %c0_8 = arith.constant 0 : index
    %c0_9 = arith.constant 0 : index
    %6 = vector.load %arg2[%c0_8, %c0_9] : memref<256x32xbf16, #tpu.memory_space<vmem>>, vector<256x32xbf16>
    %cst = arith.constant dense<0.000000e+00> : vector<71x32xf32>
    %7 = tpu.matmul %5, %6, %cst {dimension_numbers = #tpu.dot_dimension_numbers<[1], [0], [0], [1], [0, 0, 1, 1], [], []>} : vector<71x256xbf16>, vector<256x32xbf16>, vector<71x32xf32> -> vector<71x32xf32>
    %c0_10 = arith.constant 0 : index
    %c0_11 = arith.constant 0 : index
    %8 = vector.load %arg3[%c0_10, %c0_11] : memref<1x32xf32, #tpu.memory_space<vmem>>, vector<1x32xf32>
    %9 = vector.broadcast %8 : vector<1x32xf32> to vector<71x32xf32>
    %10 = arith.addf %7, %9 : vector<71x32xf32>
    %11 = vector.shape_cast %10 : vector<71x32xf32> to vector<1x71x32xf32>
    %cst_12 = arith.constant 0.000000e+00 : f32
    %12 = vector.broadcast %cst_12 : f32 to vector<1x71x32xf32>
    %13 = arith.maximumf %11, %12 : vector<1x71x32xf32>
    %c0_13 = arith.constant 0 : index
    %c0_14 = arith.constant 0 : index
    %c0_15 = arith.constant 0 : index
    %14 = vector.load %arg13[%c0_13, %c0_14, %c0_15] : memref<1x71x32xf32, #tpu.memory_space<vmem>>, vector<1x71x32xf32>
    tpu.vector_store %arg13[%c0_13, %c0_14, %c0_15], %13 {strides = array<i32>} : memref<1x71x32xf32, #tpu.memory_space<vmem>>, vector<1x71x32xf32>,
    %c0_16 = arith.constant 0 : index
    %c0_17 = arith.constant 0 : index
    %c0_18 = arith.constant 0 : index
    %15 = tpu.strided_load %arg13[%c0_16, %c0_17, %c0_18] {strides = array<i32: 1, 2, 1>} : memref<1x71x32xf32, #tpu.memory_space<vmem>>, vector<1x21x32xf32>
    %c0_19 = arith.constant 0 : index
    %c1_20 = arith.constant 1 : index
    %c0_21 = arith.constant 0 : index
    %16 = tpu.strided_load %arg13[%c0_19, %c1_20, %c0_21] {strides = array<i32: 1, 2, 1>} : memref<1x71x32xf32, #tpu.memory_space<vmem>>, vector<1x21x32xf32>
    %c0_22 = arith.constant 0 : index
    %c2 = arith.constant 2 : index
    %c0_23 = arith.constant 0 : index
    %17 = tpu.strided_load %arg13[%c0_22, %c2, %c0_23] {strides = array<i32: 1, 2, 1>} : memref<1x71x32xf32, #tpu.memory_space<vmem>>, vector<1x21x32xf32>
    %c0_24 = arith.constant 0 : index
    %c3 = arith.constant 3 : index
    %c0_25 = arith.constant 0 : index
    %18 = tpu.strided_load %arg13[%c0_24, %c3, %c0_25] {strides = array<i32: 1, 2, 1>} : memref<1x71x32xf32, #tpu.memory_space<vmem>>, vector<1x21x32xf32>
    %c0_26 = arith.constant 0 : index
    %c9_27 = arith.constant 9 : index
    %c0_28 = arith.constant 0 : index
    %19 = tpu.strided_load %arg13[%c0_26, %c9_27, %c0_28] {strides = array<i32: 1, 2, 1>} : memref<1x71x32xf32, #tpu.memory_space<vmem>>, vector<1x21x32xf32>
    %c0_29 = arith.constant 0 : index
    %c10_30 = arith.constant 10 : index
    %c0_31 = arith.constant 0 : index
    %20 = tpu.strided_load %arg13[%c0_29, %c10_30, %c0_31] {strides = array<i32: 1, 2, 1>} : memref<1x71x32xf32, #tpu.memory_space<vmem>>, vector<1x21x32xf32>
    %c0_32 = arith.constant 0 : index
    %c11 = arith.constant 11 : index
    %c0_33 = arith.constant 0 : index
    %21 = tpu.strided_load %arg13[%c0_32, %c11, %c0_33] {strides = array<i32: 1, 2, 1>} : memref<1x71x32xf32, #tpu.memory_space<vmem>>, vector<1x21x32xf32>
    %c0_34 = arith.constant 0 : index
    %c12 = arith.constant 12 : index
    %c0_35 = arith.constant 0 : index
    %22 = tpu.strided_load %arg13[%c0_34, %c12, %c0_35] {strides = array<i32: 1, 2, 1>} : memref<1x71x32xf32, #tpu.memory_space<vmem>>, vector<1x21x32xf32>
    %c0_36 = arith.constant 0 : index
    %c18 = arith.constant 18 : index
    %c0_37 = arith.constant 0 : index
    %23 = tpu.strided_load %arg13[%c0_36, %c18, %c0_37] {strides = array<i32: 1, 2, 1>} : memref<1x71x32xf32, #tpu.memory_space<vmem>>, vector<1x21x32xf32>
    %c0_38 = arith.constant 0 : index
    %c19 = arith.constant 19 : index
    %c0_39 = arith.constant 0 : index
    %24 = tpu.strided_load %arg13[%c0_38, %c19, %c0_39] {strides = array<i32: 1, 2, 1>} : memref<1x71x32xf32, #tpu.memory_space<vmem>>, vector<1x21x32xf32>
    %c0_40 = arith.constant 0 : index
    %c20 = arith.constant 20 : index
    %c0_41 = arith.constant 0 : index
    %25 = tpu.strided_load %arg13[%c0_40, %c20, %c0_41] {strides = array<i32: 1, 2, 1>} : memref<1x71x32xf32, #tpu.memory_space<vmem>>, vector<1x21x32xf32>
    %c0_42 = arith.constant 0 : index
    %c21 = arith.constant 21 : index
    %c0_43 = arith.constant 0 : index
    %26 = tpu.strided_load %arg13[%c0_42, %c21, %c0_43] {strides = array<i32: 1, 2, 1>} : memref<1x71x32xf32, #tpu.memory_space<vmem>>, vector<1x21x32xf32>
    %c0_44 = arith.constant 0 : index
    %c27 = arith.constant 27 : index
    %c0_45 = arith.constant 0 : index
    %27 = tpu.strided_load %arg13[%c0_44, %c27, %c0_45] {strides = array<i32: 1, 2, 1>} : memref<1x71x32xf32, #tpu.memory_space<vmem>>, vector<1x21x32xf32>
    %c0_46 = arith.constant 0 : index
    %c28 = arith.constant 28 : index
    %c0_47 = arith.constant 0 : index
    %28 = tpu.strided_load %arg13[%c0_46, %c28, %c0_47] {strides = array<i32: 1, 2, 1>} : memref<1x71x32xf32, #tpu.memory_space<vmem>>, vector<1x21x32xf32>
    %c0_48 = arith.constant 0 : index
    %c29 = arith.constant 29 : index
    %c0_49 = arith.constant 0 : index
    %29 = tpu.strided_load %arg13[%c0_48, %c29, %c0_49] {strides = array<i32: 1, 2, 1>} : memref<1x71x32xf32, #tpu.memory_space<vmem>>, vector<1x21x32xf32>
    %c0_50 = arith.constant 0 : index
    %c30 = arith.constant 30 : index
    %c0_51 = arith.constant 0 : index
    %30 = tpu.strided_load %arg13[%c0_50, %c30, %c0_51] {strides = array<i32: 1, 2, 1>} : memref<1x71x32xf32, #tpu.memory_space<vmem>>, vector<1x21x32xf32>
    %31 = tpu.concatenate %15, %16, %17, %18, %19, %20, %21, %22, %23, %24, %25, %26, %27, %28, %29, %30 in 2 : vector<1x21x32xf32>, vector<1x21x32xf32>, vector<1x21x32xf32>, vector<1x21x32xf32>, vector<1x21x32xf32>, vector<1x21x32xf32>, vector<1x21x32xf32>, vector<1x21x32xf32>, vector<1x21x32xf32>, vector<1x21x32xf32>, vector<1x21x32xf32>, vector<1x21x32xf32>, vector<1x21x32xf32>, vector<1x21x32xf32>, vector<1x21x32xf32>, vector<1x21x32xf32> -> vector<1x21x512xf32>
    %32 = arith.truncf %31 : vector<1x21x512xf32> to vector<1x21x512xbf16>
    %33 = vector.shape_cast %32 : vector<1x21x512xbf16> to vector<21x512xbf16>
    %c0_52 = arith.constant 0 : index
    %c0_53 = arith.constant 0 : index
    %34 = vector.load %arg4[%c0_52, %c0_53] : memref<512x64xbf16, #tpu.memory_space<vmem>>, vector<512x64xbf16>
    %cst_54 = arith.constant dense<0.000000e+00> : vector<21x64xf32>
    %35 = tpu.matmul %33, %34, %cst_54 {dimension_numbers = #tpu.dot_dimension_numbers<[1], [0], [0], [1], [0, 0, 1, 1], [], []>} : vector<21x512xbf16>, vector<512x64xbf16>, vector<21x64xf32> -> vector<21x64xf32>
    %c0_55 = arith.constant 0 : index
    %c0_56 = arith.constant 0 : index
    %36 = vector.load %arg5[%c0_55, %c0_56] : memref<1x64xf32, #tpu.memory_space<vmem>>, vector<1x64xf32>
    %37 = vector.broadcast %36 : vector<1x64xf32> to vector<21x64xf32>
    %38 = arith.addf %35, %37 : vector<21x64xf32>
    %39 = vector.shape_cast %38 : vector<21x64xf32> to vector<1x21x64xf32>
    %cst_57 = arith.constant 0.000000e+00 : f32
    %40 = vector.broadcast %cst_57 : f32 to vector<1x21x64xf32>
    %41 = arith.maximumf %39, %40 : vector<1x21x64xf32>
    %42 = arith.truncf %41 : vector<1x21x64xf32> to vector<1x21x64xbf16>
    %43 = vector.extract_strided_slice %42 {offsets = [0, 0, 0], sizes = [1, 1, 64], strides = [1, 1, 1]} : vector<1x21x64xbf16> to vector<1x1x64xbf16>
    %44 = vector.extract_strided_slice %42 {offsets = [0, 1, 0], sizes = [1, 1, 64], strides = [1, 1, 1]} : vector<1x21x64xbf16> to vector<1x1x64xbf16>
    %45 = vector.extract_strided_slice %42 {offsets = [0, 2, 0], sizes = [1, 1, 64], strides = [1, 1, 1]} : vector<1x21x64xbf16> to vector<1x1x64xbf16>
    %46 = vector.extract_strided_slice %42 {offsets = [0, 9, 0], sizes = [1, 1, 64], strides = [1, 1, 1]} : vector<1x21x64xbf16> to vector<1x1x64xbf16>
    %47 = vector.extract_strided_slice %42 {offsets = [0, 10, 0], sizes = [1, 1, 64], strides = [1, 1, 1]} : vector<1x21x64xbf16> to vector<1x1x64xbf16>
    %48 = vector.extract_strided_slice %42 {offsets = [0, 11, 0], sizes = [1, 1, 64], strides = [1, 1, 1]} : vector<1x21x64xbf16> to vector<1x1x64xbf16>
    %49 = vector.extract_strided_slice %42 {offsets = [0, 18, 0], sizes = [1, 1, 64], strides = [1, 1, 1]} : vector<1x21x64xbf16> to vector<1x1x64xbf16>
    %50 = vector.extract_strided_slice %42 {offsets = [0, 19, 0], sizes = [1, 1, 64], strides = [1, 1, 1]} : vector<1x21x64xbf16> to vector<1x1x64xbf16>
    %51 = vector.extract_strided_slice %42 {offsets = [0, 20, 0], sizes = [1, 1, 64], strides = [1, 1, 1]} : vector<1x21x64xbf16> to vector<1x1x64xbf16>
    %52 = tpu.concatenate %43, %44, %45, %46, %47, %48, %49, %50, %51 in 2 : vector<1x1x64xbf16>, vector<1x1x64xbf16>, vector<1x1x64xbf16>, vector<1x1x64xbf16>, vector<1x1x64xbf16>, vector<1x1x64xbf16>, vector<1x1x64xbf16>, vector<1x1x64xbf16>, vector<1x1x64xbf16> -> vector<1x1x576xbf16>
    %53 = vector.shape_cast %52 : vector<1x1x576xbf16> to vector<1x576xbf16>
    %c0_58 = arith.constant 0 : index
    %c0_59 = arith.constant 0 : index
    %54 = vector.load %arg6[%c0_58, %c0_59] : memref<576x64xbf16, #tpu.memory_space<vmem>>, vector<576x64xbf16>
    %cst_60 = arith.constant dense<0.000000e+00> : vector<1x64xf32>
    %55 = tpu.matmul %53, %54, %cst_60 {dimension_numbers = #tpu.dot_dimension_numbers<[1], [0], [0], [1], [0, 0, 1, 1], [], []>} : vector<1x576xbf16>, vector<576x64xbf16>, vector<1x64xf32> -> vector<1x64xf32>
    %c0_61 = arith.constant 0 : index
    %c0_62 = arith.constant 0 : index
    %56 = vector.load %arg7[%c0_61, %c0_62] : memref<1x64xf32, #tpu.memory_space<vmem>>, vector<1x64xf32>
    %57 = arith.addf %55, %56 : vector<1x64xf32>
    %58 = vector.shape_cast %57 : vector<1x64xf32> to vector<1x1x64xf32>
    %cst_63 = arith.constant 0.000000e+00 : f32
    %59 = vector.broadcast %cst_63 : f32 to vector<1x1x64xf32>
    %60 = arith.maximumf %58, %59 : vector<1x1x64xf32>
    %61 = vector.shape_cast %60 : vector<1x1x64xf32> to vector<1x64xf32>
    %62 = arith.truncf %61 : vector<1x64xf32> to vector<1x64xbf16>
    %c0_64 = arith.constant 0 : index
    %c0_65 = arith.constant 0 : index
    %63 = vector.load %arg8[%c0_64, %c0_65] : memref<64x512xbf16, #tpu.memory_space<vmem>>, vector<64x512xbf16>
    %cst_66 = arith.constant dense<0.000000e+00> : vector<1x512xf32>
    %64 = tpu.matmul %62, %63, %cst_66 {dimension_numbers = #tpu.dot_dimension_numbers<[1], [0], [0], [1], [0, 0, 1, 1], [], []>} : vector<1x64xbf16>, vector<64x512xbf16>, vector<1x512xf32> -> vector<1x512xf32>
    %c0_67 = arith.constant 0 : index
    %c0_68 = arith.constant 0 : index
    %65 = vector.load %arg9[%c0_67, %c0_68] : memref<1x512xf32, #tpu.memory_space<vmem>>, vector<1x512xf32>
    %66 = arith.addf %64, %65 : vector<1x512xf32>
    %cst_69 = arith.constant 0.000000e+00 : f32
    %67 = vector.broadcast %cst_69 : f32 to vector<1x512xf32>
    %68 = arith.maximumf %66, %67 : vector<1x512xf32>
    %69 = arith.truncf %68 : vector<1x512xf32> to vector<1x512xbf16>
    %c0_70 = arith.constant 0 : index
    %c0_71 = arith.constant 0 : index
    %70 = vector.load %arg10[%c0_70, %c0_71] : memref<512x128xbf16, #tpu.memory_space<vmem>>, vector<512x128xbf16>
    %cst_72 = arith.constant dense<0.000000e+00> : vector<1x128xf32>
    %71 = tpu.matmul %69, %70, %cst_72 {dimension_numbers = #tpu.dot_dimension_numbers<[1], [0], [0], [1], [0, 0, 1, 1], [], []>} : vector<1x512xbf16>, vector<512x128xbf16>, vector<1x128xf32> -> vector<1x128xf32>
    %c0_73 = arith.constant 0 : index
    %c0_74 = arith.constant 0 : index
    %72 = vector.load %arg11[%c0_73, %c0_74] : memref<1x128xf32, #tpu.memory_space<vmem>>, vector<1x128xf32>
    %73 = arith.addf %71, %72 : vector<1x128xf32>
    %c0_75 = arith.constant 0 : index
    %c0_76 = arith.constant 0 : index
    %c0_77 = arith.constant 0 : index
    %74 = vector.load %arg12[%c0_75, %c0_76, %c0_77] : memref<1x1x128xf32, #tpu.memory_space<vmem>>, vector<1x1x128xf32>
    %75 = vector.shape_cast %74 : vector<1x1x128xf32> to vector<1x128xf32>
    %76 = vector.shape_cast %73 : vector<1x128xf32> to vector<1x1x128xf32>
    tpu.vector_store %arg12[%c0_75, %c0_76, %c0_77], %76 {strides = array<i32>} : memref<1x1x128xf32, #tpu.memory_space<vmem>>, vector<1x1x128xf32>,
    return
  }
  func.func @transform_0(%arg0: i32) -> (i32, i32, i32) {
    %c0_i32 = arith.constant 0 : i32
    %c0_i32_0 = arith.constant 0 : i32
    %c0_i32_1 = arith.constant 0 : i32
    return %arg0, %c0_i32, %c0_i32_0 : i32, i32, i32
  }
  func.func @transform_1(%arg0: i32) -> (i32, i32) {
    %c0_i32 = arith.constant 0 : i32
    %c0_i32_0 = arith.constant 0 : i32
    %c0_i32_1 = arith.constant 0 : i32
    return %c0_i32, %c0_i32_0 : i32, i32
  }
  func.func @transform_2(%arg0: i32) -> (i32, i32) {
    %c0_i32 = arith.constant 0 : i32
    %c0_i32_0 = arith.constant 0 : i32
    %c0_i32_1 = arith.constant 0 : i32
    return %c0_i32, %c0_i32_0 : i32, i32
  }
  func.func @transform_3(%arg0: i32) -> (i32, i32) {
    %c0_i32 = arith.constant 0 : i32
    %c0_i32_0 = arith.constant 0 : i32
    %c0_i32_1 = arith.constant 0 : i32
    return %c0_i32, %c0_i32_0 : i32, i32
  }
  func.func @transform_4(%arg0: i32) -> (i32, i32) {
    %c0_i32 = arith.constant 0 : i32
    %c0_i32_0 = arith.constant 0 : i32
    %c0_i32_1 = arith.constant 0 : i32
    return %c0_i32, %c0_i32_0 : i32, i32
  }
  func.func @transform_5(%arg0: i32) -> (i32, i32) {
    %c0_i32 = arith.constant 0 : i32
    %c0_i32_0 = arith.constant 0 : i32
    %c0_i32_1 = arith.constant 0 : i32
    return %c0_i32, %c0_i32_0 : i32, i32
  }
  func.func @transform_6(%arg0: i32) -> (i32, i32) {
    %c0_i32 = arith.constant 0 : i32
    %c0_i32_0 = arith.constant 0 : i32
    %c0_i32_1 = arith.constant 0 : i32
    return %c0_i32, %c0_i32_0 : i32, i32
  }
  func.func @transform_7(%arg0: i32) -> (i32, i32) {
    %c0_i32 = arith.constant 0 : i32
    %c0_i32_0 = arith.constant 0 : i32
    %c0_i32_1 = arith.constant 0 : i32
    return %c0_i32, %c0_i32_0 : i32, i32
  }
  func.func @transform_8(%arg0: i32) -> (i32, i32) {
    %c0_i32 = arith.constant 0 : i32
    %c0_i32_0 = arith.constant 0 : i32
    %c0_i32_1 = arith.constant 0 : i32
    return %c0_i32, %c0_i32_0 : i32, i32
  }
  func.func @transform_9(%arg0: i32) -> (i32, i32) {
    %c0_i32 = arith.constant 0 : i32
    %c0_i32_0 = arith.constant 0 : i32
    %c0_i32_1 = arith.constant 0 : i32
    return %c0_i32, %c0_i32_0 : i32, i32
  }
  func.func @transform_10(%arg0: i32) -> (i32, i32) {
    %c0_i32 = arith.constant 0 : i32
    %c0_i32_0 = arith.constant 0 : i32
    %c0_i32_1 = arith.constant 0 : i32
    return %c0_i32, %c0_i32_0 : i32, i32
  }
  func.func @transform_11(%arg0: i32) -> (i32, i32, i32) {
    %c0_i32 = arith.constant 0 : i32
    %c0_i32_0 = arith.constant 0 : i32
    %c0_i32_1 = arith.constant 0 : i32
    return %arg0, %c0_i32, %c0_i32_0 : i32, i32, i32
  }
}

</mosaic_0001>

<bundles_post_ra>
// kernel: policy_net_forward.1
= control target key start
LH: loop header
LB: loop body
LE: loop exit
PB: predicated region body
PF: predicated region fallthrough
CT: control target
= control target key end

     0   :  { %16 = vsyncpa [#allocation4], 0  ;;  %s3974_s0 = inlined_call_operand.vmem [shape: bf16[2,81,64], index: 0, kind: input, shape index: {}]   ;;  %s3975_s1 = inlined_call_operand.vmem [shape: bf16[256,32], index: 1, kind: input, shape index: {}]   ;;  %s3976_s2 = inlined_call_operand.vmem [shape: f32[1,32], index: 2, kind: input, shape index: {}]   ;;  %s3977_s3 = inlined_call_operand.vmem [shape: bf16[512,64], index: 3, kind: input, shape index: {}]   ;;  %s3978_s4 = inlined_call_operand.vmem [shape: f32[1,64], index: 4, kind: input, shape index: {}]   ;;  %s3979_s5 = inlined_call_operand.vmem [shape: bf16[576,64], index: 5, kind: input, shape index: {}]   ;;  %s3980_s6 = inlined_call_operand.vmem [shape: f32[1,64], index: 6, kind: input, shape index: {}]   ;;  %s3981_s7 = inlined_call_operand.vmem [shape: bf16[64,512], index: 7, kind: input, shape index: {}]   ;;  %s3982_s8 = inlined_call_operand.vmem [shape: f32[1,512], index: 8, kind: input, shape index: {}]   ;;  %s3983_s9 = inlined_call_operand.vmem [shape: bf16[512,128], index: 9, kind: input, shape index: {}]   ;;  %s3984_s10 = inlined_call_operand.vmem [shape: f32[1,128], index: 10, kind: input, shape index: {}]   ;;  %s3985_s11 = inlined_call_operand.hbm [shape: f32[2,1,128], index: 11, kind: output, shape index: {}]  }
   0x1   :  { %18 = vsyncpa [#allocation4 + $0x1], 0  ;;  %s3291_s17 = smov 0   ;;  %s3293_s18 = smov 0  }
   0x2   :  { %s3295_s19 = smov 0   ;;  %s3297_s20 = smov 0  }
   0x3 LB: > { %3987 = sst [smem:[#allocation6_spill]] %s3218_s19  ;;  %s3312_s21 = sadd.s32 4294967295, %s3222_s20   ;;  %s3222_s20 = sphi %s3297_s20, %s3995_s20   ;;  %s3218_s19 = sphi %s3295_s19, %s3992_s19   ;;  %s3214_s18 = sphi %s3293_s18, %s3994_s18   ;;  %s3210_s17 = sphi %s3291_s17, %s3993_s17  }
   0x4   : > { %s2508_s22 = sadd.s32 4294967294, %s3222_s20   ;;  %s3316_s23 = sadd.s32 1, %s3222_s20  }
   0x5   : > { %s267_s24 = sadd.s32 1, %s3218_s19  ;;  %s264_s25 = ssub.s32 %s3222_s20, %s3316_s23 }
   0x6   : > { %p277_p0 = scmp.ne.s32.totalorder %s3218_s19, %s3214_s18  ;;  %p265_p1 = scmp.eq.s32.totalorder %s264_s25, 0 }
   0x7   : > { %p278_p2 = scmp.eq.s32.totalorder %s3312_s21, 1  ;;  %p283_p3 = scmp.ne.s32.totalorder %s3214_s18, %s3210_s17 }
   0x8   : > { %p284_p4 = scmp.eq.s32.totalorder %s2508_s22, 1  ;;  %p2511_p7 = scmp.ge.s32.totalorder %s3222_s20, 1 }
   0x9   : > { %s3327_s26 = scalar_select %p265_p1, %s3218_s19, %s267_s24  }
   0xa   : > { %p3329_p5 = por %p278_p2, %p277_p0  ;;  %p3333_p6 = por %p284_p4, %p283_p3 }
   0xb   : > { %3988 = sst [smem:[#allocation7_spill]] %s3327_s26  ;;  %p340_p8 = scmp.lt.s32.totalorder %s3222_s20, 3 }
   0xd   : > { %p341_p9 = pnand %p2511_p7, %p340_p8 }
   0xe   : > { %p379_p10 = scmp.lt.s32.totalorder (!%p341_p9), %s3312_s21, 1  ;;  %v3020_v0 = vld [vmem:[%s3975_s1 + $0x40] sm:$0xff] (!%p341_p9)   ;;  %v3022_v2 = vld [vmem:[%s3975_s1 + $0x48] sm:$0xff] (!%p341_p9)   ;;  %v3024_v4 = vld [vmem:[%s3975_s1 + $0x50] sm:$0xff] (!%p341_p9)   ;;  %vm522_vm0 = vcmask (!%p341_p9), 1046528   ;;  %vm542_vm2 = vcmask (!%p341_p9), 523264  }
   0xf   : > { %344 = sbr.rel (%p341_p9) target bundleno = 1594 (0x63a), region = 64  ;;  %2665 = vmatprep.subr.bf16.mxu0 (!%p341_p9), %v3020_v0  ;;  %v3021_v1 = vld [vmem:[%s3975_s1] sm:$0xff] (!%p341_p9)   ;;  %v3023_v3 = vld [vmem:[%s3975_s1 + $0x8] sm:$0xff] (!%p341_p9)   ;;  %vm420_vm1 = vsmask.f32 (!%p341_p9), 7424  ;;  %v3025_v5 = vld [vmem:[%s3975_s1 + $0x10] sm:$0xff] (!%p341_p9)  }
  0x10   : > { %2666 = vmatpush3.bf16.msra.mxu0 (!%p341_p9), %v3021_v1  ;;  %v3026_v35 = vld [vmem:[%s3975_s1 + $0x58] sm:$0xff] (!%p341_p9)   ;;  %v3028_v45 = vld [vmem:[%s3975_s1 + $0x60] sm:$0xff] (!%p341_p9)   ;;  %v3030_v56 = vld [vmem:[%s3975_s1 + $0x68] sm:$0xff] (!%p341_p9)   ;;  %vm794_vm3 = vcmask (!%p341_p9), 261120   ;;  %s3225_s24 = smov (!%p341_p9), 32   ;;  %vm803_vm4 = vcmask (!%p341_p9), 260096  }
  0x11   : > { %2667 = vmatprep.subr.bf16.mxu0 (!%p341_p9), %v3022_v2  ;;  %v3027_v44 = vld [vmem:[%s3975_s1 + $0x18] sm:$0xff] (!%p341_p9)   ;;  %v3029_v49 = vld [vmem:[%s3975_s1 + $0x20] sm:$0xff] (!%p341_p9)   ;;  %v3031_v1 = vld [vmem:[%s3975_s1 + $0x28] sm:$0xff] (!%p341_p9)   ;;  %s3226_s16 = smov (!%p341_p9), 96   ;;  %vm1036_vm5 = vcmask (!%p341_p9), 785408   ;;  %vm3228_vm6 = vmmov (!%p341_p9), 0  }
  0x12   : > { %v3032_v2 = vld [vmem:[%s3975_s1 + $0x70] sm:$0xff] (!%p341_p9)   ;;  %s377_s19 = sand.u32 (!%p341_p9), 1, %s3214_s18  }
  0x14   : > { %2668 = vmatpush3.bf16.msra.mxu0 (!%p341_p9), %v3023_v3 }
  0x15   : > { %2669 = vmatprep.subr.bf16.mxu0 (!%p341_p9), %v3024_v4 }
  0x16   : > { %s380_s12 = scalar_select %p379_p10, %s3312_s21, 1 }
  0x18   : > { %s2872_s22 = smul.u32 44, %s380_s12  ;;  %2670 = vmatpush3.bf16.msra.mxu0 %v3025_v5  ;;  %s3224_s12 = smov 64  }
  0x19   : > { %2671 = vmatprep.subr.bf16.mxu0 %v3026_v35 }
  0x1a   : > { %s383_s13 = scalar_lea.vmem %s3974_s0, %s2872_s22  ;;  %s2662_s22 = sshll.u32 %s3312_s21, 4 }
  0x1b   : > { %v387_v6 = vld [vmem:[%s383_s13 + $0x8] sm:$0xf]  ;;  %v388_v7 = vld [vmem:[%s383_s13 + $0xc] sm:$0xf]  ;;  %v389_v8 = vld [vmem:[%s383_s13 + $0x10] sm:$0xf]  ;;  %s3932_s30 = scalar_lea.hbm %s3985_s11, %s2662_s22 }
  0x1c   : > { %v395_v9 = vld [vmem:[%s383_s13 + $0x4] sm:$0xe]  ;;  %v3362_v10 = vcombine.low %v388_v7, %v389_v8  ;;  %v385_v11 = vld [vmem:[%s383_s13] sm:$0xf]  ;;  %v3364_v13 = vcombine.low %v387_v6, %v388_v7  ;;  %v390_v17 = vld [vmem:[%s383_s13 + $0x14] sm:$0xf]  ;;  %2672 = vmatpush3.bf16.msra.mxu0 %v3027_v44 }
  0x1d   : > { %v386_v12 = vld [vmem:[%s383_s13 + $0x4] sm:$0xf]  ;;  %v2523_v14 = vcombine.low %v395_v9, %v387_v6  ;;  %v391_v18 = vld [vmem:[%s383_s13 + $0x18] sm:$0xf]  ;;  %v392_v19 = vld [vmem:[%s383_s13 + $0x1c] sm:$0xf]  ;;  %v3374_v23 = vcombine.low %v389_v8, %v390_v17  ;;  %2673 = vmatprep.subr.bf16.mxu0 %v3028_v45 }
  0x1e   : > { %v3366_v15 = vcombine.low %v385_v11, %v386_v12  ;;  %v3368_v16 = vcombine.low %v386_v12, %v387_v6  ;;  %v524_v20 = vrot.slane %v3362_v10, 1  ;;  %v429_v21 = vshll.u32 %v3364_v13, 16  ;;  %v393_v24 = vld [vmem:[%s383_s13 + $0x20] sm:$0xf]  ;;  %v394_v25 = vld [vmem:[%s383_s13 + $0x24] sm:$0xf] }
  0x1f   : > { %v3372_v22 = vcombine.low %v390_v17, %v391_v18  ;;  %v523_v26 = vrot.slane %v2523_v14, 1  ;;  %v433_v29 = vshrl.u32 %v3364_v13, 16  ;;  %v396_v30 = vld [vmem:[%s383_s13 + $0x28] sm:$0x1]  ;;  %v437_v33 = vshll.u32 %v3374_v23, 16  ;;  %v3033_v7 = vld [vmem:[%s3975_s1 + $0x30] sm:$0xff]  }
  0x20   : > { %v422_v27 = vshrl.u32 %v3366_v15, 16  ;;  %v424_v28 = vshll.u32 %v3366_v15, 16  ;;  %v431_v31 = vrot.slane %v429_v21, 1  ;;  %v3381_v34 = vcombine.low %v392_v19, %v393_v24  ;;  %2674 = vmatpush3.bf16.msra.mxu0 %v3029_v49  ;;  %v3034_v9 = vld [vmem:[%s3975_s1 + $0x78] sm:$0xff]   ;;  %s2441_s13 = scalar_lea.sflag [#allocation4], %s377_s19  ;;  %s3230_s21 = smov [#allocation3]  }
  0x21   : > { %v526_v32 = vrot.slane %v3372_v22, 1  ;;  %v525_v36 = vsel %vm522_vm0, %v523_v26, %v524_v20  ;;  %v3387_v38 = vcombine.low %v391_v18, %v392_v19  ;;  %v441_v39 = vshrl.u32 %v3374_v23, 16  ;;  %2675 = vmatprep.subr.bf16.mxu0 %v3030_v56  ;;  %v3037_v56 = vld [vmem:[%s3977_s3] sm:$0xff]   ;;  %s3164_s15 = sshll.u32 %s3230_s21, 4  ;;  %s3165_s15 = int_to_ptr.vmem [resolvable:$false] %s3164_s15 }
  0x22   : > { %v426_v37 = vrot.slane %v424_v28, 1  ;;  %532 = vrot.lane.b32.xlu0 %v525_v36, %s3224_s12  ;;  %v435_v41 = vor.u32 %v433_v29, %v431_v31  ;;  %v439_v42 = vrot.slane %v437_v33, 1  ;;  %v528_v43 = vrot.slane %v3381_v34, 1  ;;  %s3166_s26 = scalar_lea.vmem %s3165_s15, 32 }
  0x23   : > { %v527_v40 = vsel %vm522_vm0, %v524_v20, %v526_v32  ;;  %v445_v47 = vshll.u32 %v3387_v38, 16  ;;  %v2524_v48 = vcombine.low %v394_v25, %v396_v30  ;;  %v3405_v52 = vcombine.low %v393_v24, %v393_v24 }
  0x24   : > { %v427_v46 = vor.u32 %v426_v37, %v422_v27  ;;  %534 = vrot.lane.b32.xlu1 %v527_v40, %s3224_s12  ;;  %v440_v50 = vsel %vm420_vm1, %v435_v41, %v439_v42  ;;  %v443_v51 = vor.u32 %v441_v39, %v439_v42  ;;  %v449_v55 = vshrl.u32 %v3387_v38, 16  ;;  %2676 = vmatpush3.bf16.msra.mxu0 %v3031_v1 }
  0x25   : > { %v447_v54 = vrot.slane %v445_v47, 1  ;;  %v530_v57 = vrot.slane %v2524_v48, 1  ;;  %v453_v58 = vshll.u32 %v3405_v52, 16  ;;  %v457_v59 = vshrl.u32 %v3405_v52, 16  ;;  %2677 = vmatprep.subr.bf16.mxu0 %v3032_v2 }
  0x26   : > { %v432_v53 = vsel %vm420_vm1, %v427_v46, %v431_v31  ;;  %v529_v60 = vsel %vm522_vm0, %v526_v32, %v528_v43  ;;  %v3418_v62 = vcombine.low %v394_v25, %v394_v25  ;;  %v478_v3 = vshrl.u32 %v3368_v16, 16  ;;  %v3035_v25 = vld [vmem:[%s3975_s1 + $0x38] sm:$0xff]  }
  0x27   : > { %460 = vrot.lane.b32.xlu0 %v432_v53, %s3224_s12  ;;  %v448_v61 = vsel %vm420_vm1, %v443_v51, %v447_v54  ;;  %v451_v63 = vor.u32 %v449_v55, %v447_v54  ;;  %v455_v0 = vrot.slane %v453_v58, 1  ;;  %v480_v4 = vshll.u32 %v3368_v16, 16  ;;  %v3036_v55 = vld [vmem:[%s3977_s3 + $0x40] sm:$0xff]   ;;  %v3041_v58 = vld [vmem:[%s3977_s3 + $0x10] sm:$0xff]  }
  0x28   : > { %462 = vrot.lane.b32.xlu1 %v440_v50, %s3224_s12  ;;  %v485_v5 = vshll.u32 %v3362_v10, 16  ;;  %v531_v6 = vsel %vm522_vm0, %v528_v43, %v530_v57  ;;  %v489_v8 = vshrl.u32 %v3362_v10, 16  ;;  %v493_v14 = vshll.u32 %v3372_v22, 16  ;;  %2678 = vmatpush3.bf16.msra.mxu0 %v3033_v7 }
  0x29   : > { %v482_v11 = vrot.slane %v480_v4, 1  ;;  %v497_v16 = vshrl.u32 %v3372_v22, 16  ;;  %v456_v17 = vsel %vm420_vm1, %v451_v63, %v455_v0  ;;  %v501_v18 = vshll.u32 %v3381_v34, 16  ;;  %2679 = vmatprep.subr.bf16.mxu0 %v3034_v9  ;;  %2711 = vmatprep.subr.bf16.mxu1 %v3036_v55 }
  0x2a   : > { %v487_v12 = vrot.slane %v485_v5, 1  ;;  %v505_v19 = vshrl.u32 %v3381_v34, 16  ;;  %v509_v10 = vshll.u32 %v3418_v62, 16  ;;  %v495_v24 = vrot.slane %v493_v14, 1  ;;  %2712 = vmatpush3.bf16.msra.mxu1 %v3037_v56 }
  0x2b   : > { %536 = vrot.lane.b32.xlu0 %v529_v60, %s3224_s12  ;;  %v483_v20 = vor.u32 %v482_v11, %v478_v3  ;;  %v503_v22 = vrot.slane %v501_v18, 1  ;;  %v459_v27 = vor.u32 %v457_v59, %v455_v0  ;;  %v3493_v60 = vld [vmem:[%s3976_s2] ss:$0 sm:$0xff] }
  0x2c   : > { %464 = vrot.lane.b32.xlu1 %v448_v61, %s3224_s12  ;;  %v491_v21 = vor.u32 %v489_v8, %v487_v12  ;;  %v511_v26 = vrot.slane %v509_v10, 1  ;;  %v499_v30 = vor.u32 %v497_v16, %v495_v24  ;;  %2680 = vmatpush3.bf16.msra.mxu0 %v3035_v25  ;;  %v3043_v25 = vld [vmem:[%s3977_s3 + $0x18] sm:$0xff]  }
  0x2d   : > { %v488_v28 = vsel %vm420_vm1, %v483_v20, %v487_v12  ;;  %v507_v31 = vor.u32 %v505_v19, %v503_v22  ;;  %v3042_v20 = vld [vmem:[%s3977_s3 + $0x58] sm:$0xff]  }
  0x2e   : > { %v496_v29 = vsel %vm420_vm1, %v491_v21, %v495_v24  ;;  %v504_v32 = vsel %vm420_vm1, %v499_v30, %v503_v22  ;;  %v3044_v22 = vld [vmem:[%s3977_s3 + $0x60] sm:$0xff]  }
  0x2f   : > { %538 = vrot.lane.b32.xlu0 %v531_v6, %s3224_s12  ;;  %v512_v33 = vsel %vm420_vm1, %v507_v31, %v511_v26  ;;  %v3045_v31 = vld [vmem:[%s3977_s3 + $0x20] sm:$0xff]  }
  0x30   : > { %466 = vrot.lane.b32.xlu1 %v456_v17, %s3224_s12 }
  0x33   : > { %540 = vrot.lane.b32.xlu0 %v530_v57, %s3224_s12  ;;  %v3039_v57 = vld [vmem:[%s3977_s3 + $0x8] sm:$0xff]  }
  0x34   : > { %468 = vrot.lane.b32.xlu1 %v459_v27, %s3224_s12 }
  0x94   : > { %v533_v34 = vpop.permute.xlu0 %532 }
  0x95   : > { %v560_v35 = vsel %vm542_vm2, %v488_v28, %v533_v34  ;;  %v3046_v34 = vld [vmem:[%s3977_s3 + $0x68] sm:$0xff]  }
  0x96   : > { %v535_v36 = vpop.permute.xlu1 %534  ;;  %745 = vmatprep.mubr.bf16.mxu0 %v560_v35 }
  0x97   : > { %v564_v39 = vsel %vm542_vm2, %v496_v29, %v535_v36 }
  0x99   : > { %v461_v37 = vpop.permute.xlu0 %460 }
  0x9a   : > { %v544_v40 = vsel %vm542_vm2, %v3366_v15, %v461_v37  ;;  %v463_v41 = vpop.permute.xlu1 %462  ;;  %v513_v15 = vshrl.u32 %v3418_v62, 16 }
  0x9b   : > { %746 = vmatmul.mubr.bf16.vlgmr.msra.gmra.mrb[0].mxu0 %v544_v40  ;;  %v547_v43 = vsel %vm542_vm2, %v3364_v13, %v463_v41 }
  0x9c   : > { %753 = vmatprep.mubr.bf16.mxu0 %v564_v39  ;;  %v515_v50 = vor.u32 %v513_v15, %v511_v26  ;;  %v3047_v39 = vld [vmem:[%s3977_s3 + $0x28] sm:$0xff]  }
  0x9d   : > { %v537_v42 = vpop.permute.xlu0 %536 }
  0x9e   : > { %v568_v44 = vsel %vm542_vm2, %v504_v32, %v537_v42  ;;  %v465_v45 = vpop.permute.xlu1 %464 }
  0x9f   : > { %v550_v47 = vsel %vm542_vm2, %v3374_v23, %v465_v45 }
  0xa1   : > { %v539_v46 = vpop.permute.xlu0 %538 }
  0xa2   : > { %v572_v48 = vsel %vm542_vm2, %v512_v33, %v539_v46  ;;  %v467_v49 = vpop.permute.xlu1 %466 }
  0xa3   : > { %754 = vmatmul.mubr.bf16.gmra.mrb[4].mxu0 %v547_v43  ;;  %v553_v13 = vsel %vm542_vm2, %v3387_v38, %v467_v49  ;;  %v3038_v38 = vld [vmem:[%s3977_s3 + $0x48] sm:$0xff]  }
  0xa4   : > { %761 = vmatprep.mubr.bf16.mxu0 %v568_v44  ;;  %2713 = vmatprep.subr.bf16.mxu1 %v3038_v38  ;;  %v3048_v44 = vld [vmem:[%s3977_s3 + $0x70] sm:$0xff]  }
  0xa5   : > { %v541_v51 = vpop.permute.xlu0 %540  ;;  %2714 = vmatpush3.bf16.msra.mxu1 %v3039_v57 }
  0xa6   : > { %v576_v53 = vsel %vm542_vm2, %v515_v50, %v541_v51  ;;  %v469_v54 = vpop.permute.xlu1 %468 }
  0xa7   : > { %v556_v23 = vsel %vm542_vm2, %v3405_v52, %v469_v54  ;;  %v3040_v52 = vld [vmem:[%s3977_s3 + $0x50] sm:$0xff]  }
  0xa8   : > { %2715 = vmatprep.subr.bf16.mxu1 %v3040_v52 }
  0xa9   : > { %2716 = vmatpush3.bf16.msra.mxu1 %v3041_v58 }
  0xaa   : > { %2717 = vmatprep.subr.bf16.mxu1 %v3042_v20 }
  0xab   : > { %762 = vmatmul.mubr.bf16.gmra.mrb[8].mxu0 %v550_v47  ;;  %v3049_v47 = vld [vmem:[%s3977_s3 + $0x30] sm:$0xff]  }
  0xac   : > { %769 = vmatprep.mubr.bf16.mxu0 %v572_v48 }
  0xad   : > { %2718 = vmatpush3.bf16.msra.mxu1 %v3043_v25 }
  0xae   : > { %2719 = vmatprep.subr.bf16.mxu1 %v3044_v22 }
  0xb1   : > { %2720 = vmatpush3.bf16.msra.mxu1 %v3045_v31 }
  0xb2   : > { %2721 = vmatprep.subr.bf16.mxu1 %v3046_v34 }
  0xb3   : > { %770 = vmatmul.mubr.bf16.gmra.mrb[12].mxu0 %v553_v13 }
  0xb4   : > { %777 = vmatprep.mubr.bf16.mxu0 %v576_v53 }
  0xb5   : > { %2722 = vmatpush3.bf16.msra.mxu1 %v3047_v39 }
  0xb6   : > { %2723 = vmatprep.subr.bf16.mxu1 %v3048_v44 }
  0xb9   : > { %2724 = vmatpush3.bf16.msra.mxu1 %v3049_v47 }
  0xbb   : > { %778 = vmatmul.mubr.bf16.gmra.mrb[16].mxu0 %v556_v23  ;;  %v3050_v23 = vld [vmem:[%s3977_s3 + $0x78] sm:$0xff]  }
  0xbc   : > { %2725 = vmatprep.subr.bf16.mxu1 %v3050_v23 }
 0x16e   : > { %v2681_v59 = vpop.f32.mrb[0].mxu0 }
 0x16f   : > { %v2682_v61 = vpop.f32.mrb[1].mxu0 }
 0x170   : > { %v2683_v62 = vadd.f32 %v2682_v61, %v2681_v59  ;;  %v2684_v63 = vpop.f32.mrb[2].mxu0 }
 0x171   : > { %v2685_v0 = vpop.f32.mrb[3].mxu0 }
 0x172   : > { %v748_v1 = vadd.f32 %v2683_v62, %v3493_v60  ;;  %v2686_v2 = vadd.f32 %v2685_v0, %v2684_v63 }
 0x174   : > { %v785_v3 = vmax.f32 %v748_v1, 0.0  ;;  %v751_v4 = vadd.f32 %v2686_v2, %v3493_v60  ;;  %v3051_v1 = vld [vmem:[%s3977_s3 + $0x38] sm:$0xff]  }
 0x175   : > { %2726 = vmatpush3.bf16.msra.mxu1 %v3051_v1 }
 0x176   : > { %795 = vst.msk [vmem:[#allocation2] sm:$0xff] %vm794_vm3, %v785_v3  ;;  %v786_v5 = vmax.f32 %v751_v4, 0.0  ;;  %v2687_v6 = vpop.f32.mrb[4].mxu0  ;;  %v3052_v3 = vld [vmem:[%s3977_s3 + $0xc0] sm:$0xff]  }
 0x177   : > { %v2688_v7 = vpop.f32.mrb[5].mxu0  ;;  %2739 = vmatprep.subr.bf16.mxu1 %v3052_v3 }
 0x178   : > { %796 = vst.msk [vmem:[#allocation2 + $0x8] sm:$0xff] %vm794_vm3, %v786_v5  ;;  %v2689_v8 = vadd.f32 %v2688_v7, %v2687_v6  ;;  %v2690_v9 = vpop.f32.mrb[6].mxu0 }
 0x179   : > { %v2691_v11 = vpop.f32.mrb[7].mxu0 }
 0x17a   : > { %v756_v12 = vadd.f32 %v2689_v8, %v3493_v60  ;;  %v2692_v14 = vadd.f32 %v2691_v11, %v2690_v9 }
 0x17c   : > { %v787_v16 = vmax.f32 %v756_v12, 0.0  ;;  %v759_v17 = vadd.f32 %v2692_v14, %v3493_v60 }
 0x17e   : > { %797 = vst.msk [vmem:[#allocation2 + $0x10] sm:$0xff] %vm794_vm3, %v787_v16  ;;  %v788_v18 = vmax.f32 %v759_v17, 0.0  ;;  %v2693_v19 = vpop.f32.mrb[8].mxu0 }
 0x17f   : > { %v2694_v10 = vpop.f32.mrb[9].mxu0  ;;  %v811_v36 = vld [vmem:[#allocation2 + $0x1] ss:$2 sm:$0xff] }
 0x180   : > { %798 = vst.msk [vmem:[#allocation2 + $0x18] sm:$0xff] %vm794_vm3, %v788_v18  ;;  %v2695_v21 = vadd.f32 %v2694_v10, %v2693_v19  ;;  %v2696_v24 = vpop.f32.mrb[10].mxu0 }
 0x181   : > { %v2697_v26 = vpop.f32.mrb[11].mxu0 }
 0x182   : > { %v764_v27 = vadd.f32 %v2695_v21, %v3493_v60  ;;  %v2698_v28 = vadd.f32 %v2697_v26, %v2696_v24 }
 0x184   : > { %v789_v29 = vmax.f32 %v764_v27, 0.0  ;;  %v767_v30 = vadd.f32 %v2698_v28, %v3493_v60 }
 0x185   : > { %v817_v49 = vld [vmem:[#allocation2 + $0x2] ss:$2 sm:$0xff]  ;;  %v823_v59 = vld [vmem:[#allocation2 + $0x3] ss:$2 sm:$0xff] }
 0x186   : > { %799 = vst.msk [vmem:[#allocation2 + $0x20] sm:$0xff] %vm794_vm3, %v789_v29  ;;  %v790_v32 = vmax.f32 %v767_v30, 0.0  ;;  %v2699_v33 = vpop.f32.mrb[12].mxu0 }
 0x187   : > { %v2700_v35 = vpop.f32.mrb[13].mxu0  ;;  %v813_v37 = vld [vmem:[#allocation2 + $0x11] ss:$2 sm:$0xff]  ;;  %v835_v53 = vld [vmem:[#allocation2 + $0xa] ss:$2 sm:$0xff] }
 0x188   : > { %800 = vst.msk [vmem:[#allocation2 + $0x28] sm:$0xff] %vm794_vm3, %v790_v32  ;;  %v2701_v40 = vadd.f32 %v2700_v35, %v2699_v33  ;;  %v2702_v41 = vpop.f32.mrb[14].mxu0  ;;  %v2918_v42 = vpack.i.bf16 %v813_v37, %v811_v36  ;;  %v841_v2 = vld [vmem:[#allocation2 + $0xb] ss:$2 sm:$0xff]  ;;  %v847_v9 = vld [vmem:[#allocation2 + $0xc] ss:$2 sm:$0xff] }
 0x189   : > { %v2703_v43 = vpop.f32.mrb[15].mxu0 }
 0x18a   : > { %v772_v45 = vadd.f32 %v2701_v40, %v3493_v60  ;;  %v2704_v46 = vadd.f32 %v2703_v43, %v2702_v41  ;;  %2919 = vrot.lane.b32.xlu1 %v2918_v42, %s3225_s24 }
 0x18c   : > { %v791_v48 = vmax.f32 %v772_v45, 0.0  ;;  %v775_v15 = vadd.f32 %v2704_v46, %v3493_v60 }
 0x18d   : > { %v3534_v50 = vld [vmem:[#allocation2 + $0x12] ss:$2 sm:$0xff]  ;;  %v825_v56 = vld [vmem:[#allocation2 + $0x13] ss:$2 sm:$0xff] }
 0x18e   : > { %801 = vst.msk [vmem:[#allocation2 + $0x30] sm:$0xff] %vm794_vm3, %v791_v48  ;;  %v792_v51 = vmax.f32 %v775_v15, 0.0  ;;  %v2923_v13 = vpack.i.bf16 %v3534_v50, %v817_v49  ;;  %v2705_v54 = vpop.f32.mrb[16].mxu0  ;;  %v2943_v63 = vpack.i.bf16 %v825_v56, %v823_v59  ;;  %v859_v34 = vld [vmem:[#allocation2 + $0x14] ss:$2 sm:$0xff] }
 0x18f   : > { %v837_v55 = vld [vmem:[#allocation2 + $0x1a] ss:$2 sm:$0xff]  ;;  %v2706_v38 = vpop.f32.mrb[17].mxu0  ;;  %v3543_v61 = vld [vmem:[#allocation2 + $0x1b] ss:$2 sm:$0xff] }
 0x190   : > { %802 = vst.msk [vmem:[#allocation2 + $0x38] sm:$0xff] %vm794_vm3, %v792_v51  ;;  %2924 = vrot.lane.b32.xlu1 %v2923_v13, %s3224_s12  ;;  %v2928_v57 = vpack.i.bf16 %v837_v55, %v835_v53  ;;  %v2707_v52 = vadd.f32 %v2706_v38, %v2705_v54  ;;  %v2708_v58 = vpop.f32.mrb[18].mxu0  ;;  %v2933_v4 = vpack.i.bf16 %v3543_v61, %v841_v2  ;;  %v821_v6 = vld [vmem:[#allocation2 + $0x22] ss:$2 sm:$0x1f] }
 0x191   : > { %v2709_v62 = vpop.f32.mrb[19].mxu0  ;;  %v815_v17 = vld [vmem:[#allocation2 + $0x21] ss:$2 sm:$0x1f]  ;;  %v883_v26 = vld [vmem:[#allocation2 + $0x1e] ss:$2 sm:$0xff] }
 0x192   : > { %2929 = vrot.lane.b32.xlu0 %v2928_v57, %s3225_s24  ;;  %v780_v0 = vadd.f32 %v2707_v52, %v3493_v60  ;;  %v849_v60 = vld [vmem:[#allocation2 + $0x1c] ss:$2 sm:$0xff]  ;;  %v877_v10 = vld [vmem:[#allocation2 + $0x1d] ss:$2 sm:$0xff] }
 0x193   : > { %v2938_v12 = vpack.i.bf16 %v849_v60, %v847_v9  ;;  %v827_v24 = vld [vmem:[#allocation2 + $0x23] ss:$2 sm:$0x1f]  ;;  %v805_v38 = vld [vmem:[#allocation2] ss:$2 sm:$0xff] }
 0x194   : > { %2944 = vrot.lane.b32.xlu1 %v2943_v63, %s3226_s16  ;;  %v793_v5 = vmax.f32 %v780_v0, 0.0  ;;  %v865_v41 = vld [vmem:[#allocation2 + $0x15] ss:$2 sm:$0xff] }
 0x195   : > { %v845_v7 = vld [vmem:[#allocation2 + $0x2b] ss:$2 sm:$0x1f]  ;;  %v839_v14 = vld [vmem:[#allocation2 + $0x2a] ss:$2 sm:$0x1f] }
 0x196   : > { %2934 = vrot.lane.b32.xlu0 %v2933_v4, %s3224_s12  ;;  %804 = vst.msk [vmem:[#allocation2 + $0x40] sm:$0x7f] %vm803_vm4, %v793_v5  ;;  %v2953_v8 = vpack.i.bf16 %v821_v6, %v845_v7  ;;  %v2948_v19 = vpack.i.bf16 %v815_v17, %v839_v14  ;;  %v851_v20 = vld [vmem:[#allocation2 + $0x2c] ss:$2 sm:$0x1f] }
 0x197   : > { %v873_v11 = vld [vmem:[#allocation2 + $0x2c] ss:$2 sm:$0xff]  ;;  %v879_v18 = vld [vmem:[#allocation2 + $0x2d] ss:$2 sm:$0xff]  ;;  %v2958_v22 = vpack.i.bf16 %v827_v24, %v851_v20  ;;  %v3053_v20 = vld [vmem:[%s3977_s3 + $0x80] sm:$0xff]  }
 0x198   : > { %2954 = vrot.lane.b32.xlu1 %v2953_v8, %s3224_s12  ;;  %v2973_v16 = vpack.i.bf16 %v873_v11, %v849_v60  ;;  %v2978_v21 = vpack.i.bf16 %v879_v18, %v877_v10  ;;  %v885_v25 = vld [vmem:[#allocation2 + $0x2e] ss:$2 sm:$0xff]  ;;  %v855_v27 = vld [vmem:[#allocation2 + $0x23] ss:$2 sm:$0xff] }
 0x199   : > { %v857_v28 = vld [vmem:[#allocation2 + $0x33] ss:$2 sm:$0x1f]  ;;  %v2983_v30 = vpack.i.bf16 %v885_v25, %v883_v26  ;;  %v2963_v31 = vpack.i.bf16 %v855_v27, %v825_v56  ;;  %v861_v33 = vld [vmem:[#allocation2 + $0x24] ss:$2 sm:$0xff] }
 0x19a   : > { %2939 = vrot.lane.b32.xlu0 %v2938_v12, %s3226_s16  ;;  %v869_v35 = vld [vmem:[#allocation2 + $0x35] ss:$2 sm:$0x1f]  ;;  %v2968_v37 = vpack.i.bf16 %v861_v33, %v859_v34  ;;  %v867_v39 = vld [vmem:[#allocation2 + $0x25] ss:$2 sm:$0xff] }
 0x19b   : > { %v2988_v42 = vpack.i.bf16 %v867_v39, %v865_v41  ;;  %v863_v43 = vld [vmem:[#allocation2 + $0x34] ss:$2 sm:$0x1f]  ;;  %v829_v4 = vld [vmem:[#allocation2 + $0x9] ss:$2 sm:$0xff] }
 0x19c   : > { %2974 = vrot.lane.b32.xlu1 %v2973_v16, %s3225_s24  ;;  %v807_v56 = vld [vmem:[#allocation2 + $0x10] ss:$2 sm:$0xff]  ;;  %v831_v5 = vld [vmem:[#allocation2 + $0x19] ss:$2 sm:$0xff]  ;;  %v3055_v39 = vld [vmem:[%s3977_s3 + $0x88] sm:$0xff]  }
 0x19d   : > { %v875_v29 = vld [vmem:[#allocation2 + $0x3c] ss:$2 sm:$0x1f]  ;;  %v881_v44 = vld [vmem:[#allocation2 + $0x3d] ss:$2 sm:$0x1f] }
 0x19e   : > { %2949 = vrot.lane.b32.xlu0 %v2948_v19, %s3225_s24  ;;  %v2993_v32 = vpack.i.bf16 %v857_v28, %v875_v29  ;;  %v887_v36 = vld [vmem:[#allocation2 + $0x3e] ss:$2 sm:$0x1f]  ;;  %v2998_v45 = vpack.i.bf16 %v863_v43, %v881_v44  ;;  %v833_v29 = vld [vmem:[#allocation2 + $0x29] ss:$2 sm:$0x1f] }
 0x19f   : > { %v3003_v40 = vpack.i.bf16 %v869_v35, %v887_v36  ;;  %v809_v28 = vld [vmem:[#allocation2 + $0x20] ss:$2 sm:$0x1f]  ;;  %v3056_v43 = vld [vmem:[%s3977_s3 + $0xd0] sm:$0xff]  }
 0x1a0   : > { %2979 = vrot.lane.b32.xlu1 %v2978_v21, %s3224_s12 }
 0x1a2   : > { %2959 = vrot.lane.b32.xlu0 %v2958_v22, %s3226_s16  ;;  %v3054_v22 = vld [vmem:[%s3977_s3 + $0xc8] sm:$0xff]  }
 0x1a4   : > { %2984 = vrot.lane.b32.xlu1 %v2983_v30, %s3226_s16 }
 0x1a6   : > { %2964 = vrot.lane.b32.xlu0 %v2963_v31, %s3225_s24 }
 0x1a8   : > { %2994 = vrot.lane.b32.xlu1 %v2993_v32, %s3225_s24 }
 0x1aa   : > { %2969 = vrot.lane.b32.xlu0 %v2968_v37, %s3224_s12 }
 0x1ac   : > { %3004 = vrot.lane.b32.xlu1 %v3003_v40, %s3226_s16  ;;  %v870_v40 = vld [vmem:[#allocation2 + $0x2b] ss:$2 sm:$0xff] }
 0x1ae   : > { %2989 = vrot.lane.b32.xlu0 %v2988_v42, %s3226_s16 }
 0x1b2   : > { %2999 = vrot.lane.b32.xlu0 %v2998_v45, %s3224_s12 }
 0x1fc   : > { %v2920_v46 = vpop.permute.xlu1 %2919 }
 0x1fd   : > { %v2922_v49 = vunpack.i.h.bf16 %v2920_v46  ;;  %v2921_v51 = vunpack.i.l.bf16 %v2920_v46 }
 0x1ff   : > { %v1031_v63 = vsel %vm794_vm3, %v807_v56, %v2922_v49  ;;  %v1030_v0 = vsel %vm794_vm3, %v805_v38, %v2921_v51 }
 0x202   : > { %v2925_v47 = vpop.permute.xlu1 %2924 }
 0x203   : > { %v2927_v13 = vunpack.i.h.bf16 %v2925_v47  ;;  %v2926_v53 = vunpack.i.l.bf16 %v2925_v47 }
 0x204   : > { %v2930_v48 = vpop.permute.xlu0 %2929 }
 0x205   : > { %v2932_v23 = vunpack.i.h.bf16 %v2930_v48  ;;  %v2931_v55 = vunpack.i.l.bf16 %v2930_v48  ;;  %v1034_v1 = vsel %vm542_vm2, %v1031_v63, %v2927_v13  ;;  %v1033_v2 = vsel %vm542_vm2, %v1030_v0, %v2926_v53  ;;  %v3060_v63 = vld [vmem:[%s3977_s3 + $0xe0] sm:$0xff]  }
 0x206   : > { %v2945_v15 = vpop.permute.xlu1 %2944 }
 0x207   : > { %v2947_v57 = vunpack.i.h.bf16 %v2945_v15  ;;  %v2946_v52 = vunpack.i.l.bf16 %v2945_v15  ;;  %v1040_v60 = vsel %vm794_vm3, %v829_v4, %v2931_v55  ;;  %v1041_v8 = vsel %vm794_vm3, %v831_v5, %v2932_v23  ;;  %v3063_v4 = vld [vmem:[%s3977_s3 + $0xa8] sm:$0xff]  }
 0x208   : > { %v2935_v54 = vpop.permute.xlu0 %2934 }
 0x209   : > { %v2937_v58 = vunpack.i.h.bf16 %v2935_v54  ;;  %v2936_v59 = vunpack.i.l.bf16 %v2935_v54  ;;  %v1037_v14 = vsel %vm1036_vm5, %v1033_v2, %v2946_v52  ;;  %v1038_v16 = vsel %vm1036_vm5, %v1034_v1, %v2947_v57  ;;  %v3058_v52 = vld [vmem:[%s3977_s3 + $0xd8] sm:$0xff]   ;;  %v3061_v1 = vld [vmem:[%s3977_s3 + $0xa0] sm:$0xff]   ;;  %v3062_v2 = vld [vmem:[%s3977_s3 + $0xe8] sm:$0xff]  }
 0x20a   : > { %v2955_v62 = vpop.permute.xlu1 %2954  ;;  %v1067_v25 = vpack.c.bf16 %v1038_v16, %v1037_v14  ;;  %v3066_v16 = vld [vmem:[%s3977_s3 + $0xf8] sm:$0xff]  }
 0x20b   : > { %v1043_v11 = vsel %vm542_vm2, %v1040_v60, %v2936_v59  ;;  %v1044_v12 = vsel %vm542_vm2, %v1041_v8, %v2937_v58  ;;  %v2957_v33 = vunpack.i.h.bf16 %v2955_v62  ;;  %v2956_v34 = vunpack.i.l.bf16 %v2955_v62  ;;  %v3059_v62 = vld [vmem:[%s3977_s3 + $0x98] sm:$0xff]  }
 0x20c   : > { %v2940_v3 = vpop.permute.xlu0 %2939 }
 0x20d   : > { %v2942_v6 = vunpack.i.h.bf16 %v2940_v3  ;;  %v2941_v7 = vunpack.i.l.bf16 %v2940_v3 }
 0x20e   : > { %v2975_v9 = vpop.permute.xlu1 %2974 }
 0x20f   : > { %v1046_v17 = vsel %vm1036_vm5, %v1043_v11, %v2941_v7  ;;  %v1047_v18 = vsel %vm1036_vm5, %v1044_v12, %v2942_v6  ;;  %v2977_v26 = vunpack.i.h.bf16 %v2975_v9  ;;  %v2976_v27 = vunpack.i.l.bf16 %v2975_v9  ;;  %v3064_v6 = vld [vmem:[%s3977_s3 + $0xf0] sm:$0xff]  }
 0x210   : > { %v2950_v19 = vpop.permute.xlu0 %2949  ;;  %v1068_v10 = vpack.c.bf16 %v1047_v18, %v1046_v17  ;;  %v3065_v11 = vld [vmem:[%s3977_s3 + $0xb0] sm:$0xff]   ;;  %v872_v17 = vld [vmem:[#allocation2 + $0x3b] ss:$2 sm:$0x1f] }
 0x211   : > { %v2952_v21 = vunpack.i.h.bf16 %v2950_v19  ;;  %v2951_v24 = vunpack.i.l.bf16 %v2950_v19  ;;  %v1059_v44 = vsel %vm794_vm3, %v870_v40, %v2977_v26  ;;  %v1058_v45 = vsel %vm794_vm3, %v3543_v61, %v2976_v27  ;;  %v3057_v61 = vld [vmem:[%s3977_s3 + $0x90] sm:$0xff]   ;;  %v3067_v26 = vld [vmem:[%s3977_s3 + $0xb8] sm:$0xff]  }
 0x212   : > { %v2980_v30 = vpop.permute.xlu1 %2979  ;;  %1370 = vmatprep.mubr.bf16.mxu1 %v1068_v10 }
 0x213   : > { %v1032_v31 = vsel %vm794_vm3, %v809_v28, %v2952_v21  ;;  %v1042_v32 = vsel %vm794_vm3, %v833_v29, %v2951_v24  ;;  %1371 = vmatmul.mubr.bf16.vlgmr.msra.gmra.mrb[0].mxu1 %v1067_v25  ;;  %v2982_v35 = vunpack.i.h.bf16 %v2980_v30  ;;  %v2981_v36 = vunpack.i.l.bf16 %v2980_v30 }
 0x214   : > { %2740 = vmatpush3.bf16.msra.mxu1 %v3053_v20  ;;  %v2960_v37 = vpop.permute.xlu0 %2959  ;;  %v1045_v47 = vsel %vm542_vm2, %v1042_v32, %v2956_v34  ;;  %v1035_v48 = vsel %vm542_vm2, %v1032_v31, %v2957_v33  ;;  %v852_v20 = vld [vmem:[#allocation2 + $0x22] ss:$2 sm:$0xff]  ;;  %v854_v34 = vld [vmem:[#allocation2 + $0x32] ss:$2 sm:$0x1f] }
 0x215   : > { %v2962_v41 = vunpack.i.h.bf16 %v2960_v37  ;;  %v2961_v42 = vunpack.i.l.bf16 %v2960_v37  ;;  %2741 = vmatprep.subr.bf16.mxu1 %v3054_v22  ;;  %v1061_v53 = vsel %vm542_vm2, %v1058_v45, %v2981_v36  ;;  %v1062_v54 = vsel %vm542_vm2, %v1059_v44, %v2982_v35  ;;  %v3069_v44 = vld [vmem:[%s3979_s5] sm:$0xff]   ;;  %v3070_v45 = vld [vmem:[%s3979_s5 + $0x48] sm:$0xff]  }
 0x216   : > { %v2985_v46 = vpop.permute.xlu1 %2984 }
 0x217   : > { %v2987_v15 = vunpack.i.h.bf16 %v2985_v46  ;;  %v2986_v49 = vunpack.i.l.bf16 %v2985_v46  ;;  %v1048_v51 = vsel %vm1036_vm5, %v1045_v47, %v2961_v42  ;;  %v1039_v13 = vsel %vm1036_vm5, %v1035_v48, %v2962_v41  ;;  %v3075_v46 = vld [vmem:[%s3979_s5 + $0xc0] sm:$0xff]   ;;  %v3071_v47 = vld [vmem:[%s3979_s5 + $0x8] sm:$0xff]  }
 0x218   : > { %2742 = vmatpush3.bf16.msra.mxu1 %v3055_v39  ;;  %v2965_v23 = vpop.permute.xlu0 %2964  ;;  %v1072_v55 = vpack.c.bf16 %v1048_v51, %v1048_v51  ;;  %v1071_v56 = vpack.c.bf16 %v1039_v13, %v1039_v13  ;;  %v3077_v48 = vld [vmem:[%s3979_s5 + $0x80] sm:$0xff]   ;;  %v3080_v51 = vld [vmem:[%s3979_s5 + $0x88] sm:$0xff]   ;;  %v3082_v13 = vld [vmem:[%s3979_s5 + $0xd0] sm:$0xff]  }
 0x219   : > { %2743 = vmatprep.subr.bf16.mxu1 %v3056_v43  ;;  %v1064_v38 = vsel %vm1036_vm5, %v1061_v53, %v2986_v49  ;;  %v1065_v57 = vsel %vm1036_vm5, %v1062_v54, %v2987_v15  ;;  %v2967_v60 = vunpack.i.h.bf16 %v2965_v23  ;;  %v2966_v8 = vunpack.i.l.bf16 %v2965_v23  ;;  %v3068_v43 = vld [vmem:[%s3979_s5 + $0x40] sm:$0xff]   ;;  %v3078_v15 = vld [vmem:[%s3979_s5 + $0xc8] sm:$0xff]   ;;  %v3072_v49 = vld [vmem:[%s3979_s5 + $0x50] sm:$0xff]  }
 0x21a   : > { %1378 = vmatprep.mubr.bf16.mxu1 %v1072_v55  ;;  %v1070_v58 = vpack.c.bf16 %v1065_v57, %v1064_v38  ;;  %v2995_v3 = vpop.permute.xlu1 %2994  ;;  %2767 = vmatprep.subr.bf16.mxu0 %v3068_v43  ;;  %v3073_v53 = vld [vmem:[%s3979_s5 + $0x10] sm:$0xff]   ;;  %v3074_v54 = vld [vmem:[%s3979_s5 + $0x58] sm:$0xff]   ;;  %v3090_v57 = vld [vmem:[%s3979_s5 + $0xe0] sm:$0xff]  }
 0x21b   : > { %1379 = vmatmul.mubr.bf16.gmra.mrb[4].mxu1 %v1071_v56  ;;  %v2996_v7 = vunpack.i.l.bf16 %v2995_v3  ;;  %v1050_v24 = vsel %vm794_vm3, %v852_v20, %v2967_v60  ;;  %v1049_v25 = vsel %vm794_vm3, %v3534_v50, %v2966_v8  ;;  %v2997_v30 = vunpack.i.h.bf16 %v2995_v3  ;;  %2768 = vmatpush3.bf16.msra.mxu0 %v3069_v44  ;;  %v3083_v23 = vld [vmem:[%s3979_s5 + $0x90] sm:$0xff]   ;;  %v3086_v55 = vld [vmem:[%s3979_s5 + $0xd8] sm:$0xff]  }
 0x21c   : > { %2744 = vmatpush3.bf16.msra.mxu1 %v3057_v61  ;;  %v2970_v59 = vpop.permute.xlu0 %2969  ;;  %1418 = vmatprep.mubr.bf16.mxu1 %v1070_v58  ;;  %v3076_v56 = vld [vmem:[%s3979_s5 + $0x18] sm:$0xff]   ;;  %v3079_v61 = vld [vmem:[%s3979_s5 + $0x60] sm:$0xff]   ;;  %v3084_v58 = vld [vmem:[%s3979_s5 + $0x68] sm:$0xff]  }
 0x21d   : > { %2745 = vmatprep.subr.bf16.mxu1 %v3058_v52  ;;  %v2972_v12 = vunpack.i.h.bf16 %v2970_v59  ;;  %v2971_v14 = vunpack.i.l.bf16 %v2970_v59  ;;  %v1060_v21 = vsel %vm794_vm3, %v872_v17, %v2996_v7  ;;  %v1051_v36 = vsel %vm794_vm3, %v854_v34, %v2997_v30  ;;  %2769 = vmatprep.subr.bf16.mxu0 %v3070_v45  ;;  %v3087_v38 = vld [vmem:[%s3979_s5 + $0x98] sm:$0xff]   ;;  %v3081_v52 = vld [vmem:[%s3979_s5 + $0x20] sm:$0xff]  }
 0x21e   : > { %v3005_v18 = vpop.permute.xlu1 %3004  ;;  %v3091_v59 = vld [vmem:[%s3979_s5 + $0xa0] sm:$0xff]   ;;  %v3092_v3 = vld [vmem:[%s3979_s5 + $0x78] sm:$0xff]  }
 0x21f   : > { %v1052_v27 = vsel %vm542_vm2, %v1049_v25, %v2971_v14  ;;  %v1053_v28 = vsel %vm542_vm2, %v1050_v24, %v2972_v12  ;;  %v3006_v29 = vunpack.i.l.bf16 %v3005_v18  ;;  %v3007_v40 = vunpack.i.h.bf16 %v3005_v18  ;;  %2770 = vmatpush3.bf16.msra.mxu0 %v3071_v47  ;;  %v2542_v18 = vld [vmem:[%s3978_s4] ss:$0 sm:$0xff]  ;;  %v3096_v25 = vld [vmem:[%s3979_s5 + $0xf0] sm:$0xff]  }
 0x220   : > { %2746 = vmatpush3.bf16.msra.mxu1 %v3059_v62  ;;  %v2990_v0 = vpop.permute.xlu0 %2989  ;;  %2771 = vmatprep.subr.bf16.mxu0 %v3072_v49  ;;  %v3093_v62 = vld [vmem:[%s3979_s5 + $0xe8] sm:$0xff]  }
 0x221   : > { %2747 = vmatprep.subr.bf16.mxu1 %v3060_v63  ;;  %v2992_v19 = vunpack.i.h.bf16 %v2990_v0  ;;  %v2991_v10 = vunpack.i.l.bf16 %v2990_v0  ;;  %v3085_v63 = vld [vmem:[%s3979_s5 + $0x28] sm:$0xff]   ;;  %v3088_v0 = vld [vmem:[%s3979_s5 + $0x70] sm:$0xff]  }
 0x223   : > { %v1055_v31 = vsel %vm1036_vm5, %v1052_v27, %v2991_v10  ;;  %v1056_v32 = vsel %vm1036_vm5, %v1053_v28, %v2992_v19  ;;  %2772 = vmatpush3.bf16.msra.mxu0 %v3073_v53  ;;  %v3227_v27 = vmov 0.0  }
 0x224   : > { %2748 = vmatpush3.bf16.msra.mxu1 %v3061_v1  ;;  %v3000_v5 = vpop.permute.xlu0 %2999  ;;  %v1069_v35 = vpack.c.bf16 %v1056_v32, %v1055_v31  ;;  %2773 = vmatprep.subr.bf16.mxu0 %v3074_v54  ;;  %v3095_v1 = vld [vmem:[%s3979_s5 + $0xa8] sm:$0xff]   ;;  %v3099_v32 = vld [vmem:[%s3979_s5 + $0xf8] sm:$0xff]   ;;  %v3098_v54 = vld [vmem:[%s3979_s5 + $0x100] sm:$0xff]  }
 0x225   : > { %2749 = vmatprep.subr.bf16.mxu1 %v3062_v2  ;;  %v3001_v9 = vunpack.i.l.bf16 %v3000_v5  ;;  %v3002_v33 = vunpack.i.h.bf16 %v3000_v5  ;;  %v3089_v2 = vld [vmem:[%s3979_s5 + $0x30] sm:$0xff]  }
 0x227   : > { %v1063_v22 = vsel %vm542_vm2, %v1060_v21, %v3001_v9  ;;  %v1054_v39 = vsel %vm542_vm2, %v1051_v36, %v3002_v33  ;;  %2774 = vmatpush3.bf16.msra.mxu0 %v3076_v56  ;;  %v3100_v33 = vld [vmem:[%s3979_s5 + $0xb8] sm:$0xff]   ;;  %v3101_v56 = vld [vmem:[%s3979_s5 + $0x108] sm:$0xff]  }
 0x228   : > { %2750 = vmatpush3.bf16.msra.mxu1 %v3063_v4  ;;  %v1066_v50 = vsel %vm1036_vm5, %v1063_v22, %v3006_v29  ;;  %v1057_v41 = vsel %vm1036_vm5, %v1054_v39, %v3007_v40  ;;  %2775 = vmatprep.subr.bf16.mxu0 %v3079_v61  ;;  %v3094_v4 = vld [vmem:[%s3979_s5 + $0x38] sm:$0xff]   ;;  %v3097_v22 = vld [vmem:[%s3979_s5 + $0xb0] sm:$0xff]  }
 0x229   : > { %2751 = vmatprep.subr.bf16.mxu1 %v3064_v6  ;;  %v1074_v37 = vpack.c.bf16 %v1066_v50, %v1066_v50  ;;  %v1073_v42 = vpack.c.bf16 %v1057_v41, %v1057_v41 }
 0x22b   : > { %2776 = vmatpush3.bf16.msra.mxu0 %v3081_v52 }
 0x22c   : > { %2752 = vmatpush3.bf16.msra.mxu1 %v3065_v11  ;;  %2777 = vmatprep.subr.bf16.mxu0 %v3084_v58 }
 0x22d   : > { %2753 = vmatprep.subr.bf16.mxu1 %v3066_v16 }
 0x22f   : > { %2778 = vmatpush3.bf16.msra.mxu0 %v3085_v63  ;;  %v3103_v63 = vld [vmem:[%s3979_s5 + $0x118] sm:$0xff]  }
 0x230   : > { %2754 = vmatpush3.bf16.msra.mxu1 %v3067_v26  ;;  %2779 = vmatprep.subr.bf16.mxu0 %v3088_v0 }
 0x231   : > { %2789 = vmatprep.subr.bf16.mxu1 %v3075_v46 }
 0x233   : > { %1419 = vmatmul.mubr.bf16.vlgmr.msra.gmra.mrb[8].mxu1 %v1069_v35  ;;  %2780 = vmatpush3.bf16.msra.mxu0 %v3089_v2  ;;  %v3106_v2 = vld [vmem:[%s3981_s7 + $0x4] ss:$16 sps:$4 sm:$0xff]  }
 0x234   : > { %1426 = vmatprep.mubr.bf16.mxu1 %v1074_v37  ;;  %2790 = vmatpush3.bf16.msra.mxu1 %v3077_v48 }
 0x235   : > { %2791 = vmatprep.subr.bf16.mxu1 %v3078_v15  ;;  %2781 = vmatprep.subr.bf16.mxu0 %v3092_v3  ;;  %v3107_v3 = vld [vmem:[%s3981_s7 + $0x8] ss:$16 sps:$4 sm:$0xff]  }
 0x237   : > { %2782 = vmatpush3.bf16.msra.mxu0 %v3094_v4  ;;  %v3109_v4 = vld [vmem:[%s3981_s7 + $0xc] ss:$16 sps:$4 sm:$0xff]  }
 0x238   : > { %2792 = vmatpush3.bf16.msra.mxu1 %v3080_v51  ;;  %2860 = vmatprep.subr.bf16.mxu0 %v3227_v27 }
 0x239   : > { %2793 = vmatprep.subr.bf16.mxu1 %v3082_v13 }
 0x23b   : > { %1427 = vmatmul.mubr.bf16.gmra.mrb[12].mxu1 %v1073_v42 }
 0x23c   : > { %2794 = vmatpush3.bf16.msra.mxu1 %v3083_v23 }
 0x23d   : > { %2795 = vmatprep.subr.bf16.mxu1 %v3086_v55 }
 0x240   : > { %2796 = vmatpush3.bf16.msra.mxu1 %v3087_v38 }
 0x241   : > { %2797 = vmatprep.subr.bf16.mxu1 %v3090_v57 }
 0x244   : > { %2798 = vmatpush3.bf16.msra.mxu1 %v3091_v59 }
 0x245   : > { %2799 = vmatprep.subr.bf16.mxu1 %v3093_v62  ;;  %v3102_v62 = vld [vmem:[%s3979_s5 + $0x110] sm:$0xff]  }
 0x248   : > { %2800 = vmatpush3.bf16.msra.mxu1 %v3095_v1  ;;  %v3104_v1 = vld [vmem:[%s3981_s7] ss:$16 sps:$4 sm:$0xff]  }
 0x249   : > { %2801 = vmatprep.subr.bf16.mxu1 %v3096_v25 }
 0x24c   : > { %2802 = vmatpush3.bf16.msra.mxu1 %v3097_v22 }
 0x24d   : > { %2803 = vmatprep.subr.bf16.mxu1 %v3099_v32 }
 0x250   : > { %2804 = vmatpush3.bf16.msra.mxu1 %v3100_v33 }
 0x251   : > { %2053 = vmatprep.subr.bf16.mxu1 %v3109_v4  ;;  %v3158_v4 = vld [vmem:[%s3983_s9 + $0x38] sm:$0xff]  }
 0x2e6   : > { %v2727_v5 = vpop.f32.mrb[0].mxu1 }
 0x2e7   : > { %v2728_v6 = vpop.f32.mrb[1].mxu1 }
 0x2e8   : > { %v2729_v7 = vadd.f32 %v2728_v6, %v2727_v5  ;;  %v2730_v60 = vpop.f32.mrb[2].mxu1  ;;  %v3110_v5 = vld [vmem:[%s3981_s7 + $0x20] ss:$16 sps:$4 sm:$0xff]   ;;  %v3112_v6 = vld [vmem:[%s3981_s7 + $0x24] ss:$16 sps:$4 sm:$0xff]  }
 0x2e9   : > { %v2731_v8 = vpop.f32.mrb[3].mxu1 }
 0x2ea   : > { %v2732_v9 = vadd.f32 %v2731_v8, %v2730_v60  ;;  %v1373_v20 = vadd.f32 %v2729_v7, %v2542_v18  ;;  %v3113_v7 = vld [vmem:[%s3981_s7 + $0x28] ss:$16 sps:$4 sm:$0xff]   ;;  %v3115_v60 = vld [vmem:[%s3981_s7 + $0x2c] ss:$16 sps:$4 sm:$0xff]   ;;  %v3118_v8 = vld [vmem:[%s3981_s7 + $0x44] ss:$16 sps:$4 sm:$0xff]  }
 0x2ec   : > { %v1376_v28 = vadd.f32 %v2732_v9, %v2542_v18  ;;  %v3121_v9 = vld [vmem:[%s3981_s7 + $0x4c] ss:$16 sps:$4 sm:$0xff]  }
 0x2ee   : > { %v2733_v11 = vpop.f32.mrb[4].mxu1 }
 0x2ef   : > { %v2734_v12 = vpop.f32.mrb[5].mxu1 }
 0x2f0   : > { %v2735_v14 = vadd.f32 %v2734_v12, %v2733_v11  ;;  %v2736_v16 = vpop.f32.mrb[6].mxu1  ;;  %v3116_v11 = vld [vmem:[%s3981_s7 + $0x40] ss:$16 sps:$4 sm:$0xff]   ;;  %v3119_v12 = vld [vmem:[%s3981_s7 + $0x48] ss:$16 sps:$4 sm:$0xff]  }
 0x2f1   : > { %v2737_v17 = vpop.f32.mrb[7].mxu1  ;;  %v3124_v16 = vld [vmem:[%s3981_s7 + $0x64] ss:$16 sps:$4 sm:$0xff]  }
 0x2f2   : > { %v1381_v37 = vadd.f32 %v2735_v14, %v2542_v18  ;;  %v3122_v14 = vld [vmem:[%s3981_s7 + $0x60] ss:$16 sps:$4 sm:$0xff]   ;;  %v3125_v17 = vld [vmem:[%s3981_s7 + $0x68] ss:$16 sps:$4 sm:$0xff]   ;;  %v3127_v18 = vld [vmem:[%s3981_s7 + $0x6c] ss:$16 sps:$4 sm:$0xff]  }
 0x306   : > { %v2755_v19 = vpop.f32.mrb[8].mxu1 }
 0x307   : > { %v2756_v10 = vpop.f32.mrb[9].mxu1 }
 0x308   : > { %v2757_v21 = vadd.f32 %v2756_v10, %v2755_v19  ;;  %v2758_v24 = vpop.f32.mrb[10].mxu1  ;;  %v3229_v19 = vmov 0   ;;  %v3128_v10 = vld [vmem:[%s3983_s9 + $0x40] sm:$0xff]  }
 0x309   : > { %v2759_v26 = vpop.f32.mrb[11].mxu1 }
 0x30a   : > { %v1421_v29 = vadd.f32 %v2757_v21, %v1373_v20  ;;  %v2760_v30 = vadd.f32 %v2759_v26, %v2758_v24  ;;  %v3129_v20 = vld [vmem:[%s3983_s9 + $0xc0] sm:$0xff]  }
 0x30c   : > { %v1424_v31 = vadd.f32 %v2760_v30, %v1376_v28  ;;  %v1434_v50 = vmax.f32 %v1421_v29, 0.0 }
 0x30e   : > { %v1435_v34 = vmax.f32 %v1424_v31, 0.0  ;;  %v2761_v35 = vpop.f32.mrb[12].mxu1 }
 0x30f   : > { %v2762_v36 = vpop.f32.mrb[13].mxu1 }
 0x310   : > { %v1437_v39 = vpack.c.bf16 %v1435_v34, %v1434_v50  ;;  %v2763_v40 = vadd.f32 %v2762_v36, %v2761_v35  ;;  %v2764_v41 = vpop.f32.mrb[14].mxu1 }
 0x311   : > { %v2765_v42 = vpop.f32.mrb[15].mxu1  ;;  %v3130_v41 = vld [vmem:[%s3983_s9] sm:$0xff]  }
 0x312   : > { %v1429_v43 = vadd.f32 %v2763_v40, %v1381_v37  ;;  %v1440_v44 = vshrl.u32 %v1437_v39, 16  ;;  %v1445_v13 = vrot.slane %v1437_v39, 1  ;;  %v1449_v57 = vrot.slane %v1437_v39, 5  ;;  %v3131_v42 = vld [vmem:[%s3983_s9 + $0x80] sm:$0xff]  }
 0x314   : > { %v1436_v45 = vmax.f32 %v1429_v43, 0.0  ;;  %1442 = vrot.lane.b32.xlu1 %v1440_v44, %s3224_s12  ;;  %v1446_v46 = vrot.slane %v1440_v44, 4  ;;  %v1450_v48 = vrot.slane %v1440_v44, 5  ;;  %v3132_v44 = vld [vmem:[%s3983_s9 + $0x48] sm:$0xff]  }
 0x316   : > { %v1438_v47 = vpack.c.bf16 %v1436_v45, %v1436_v45  ;;  %1447 = vrot.lane.b32.xlu0 %v1446_v46, %s3224_s12  ;;  %v3133_v45 = vld [vmem:[%s3983_s9 + $0xc8] sm:$0xff]  }
 0x317   : > { %v3134_v46 = vld [vmem:[%s3983_s9 + $0x8] sm:$0xff]  }
 0x318   : > { %1451 = vrot.lane.b32.xlu1 %v1450_v48, %s3224_s12  ;;  %v1456_v15 = vshrl.u32 %v1438_v47, 16  ;;  %v1454_v38 = vrot.slane %v1438_v47, 1  ;;  %v1461_v0 = vrot.slane %v1438_v47, 2  ;;  %v3135_v47 = vld [vmem:[%s3983_s9 + $0x88] sm:$0xff]   ;;  %v3136_v48 = vld [vmem:[%s3983_s9 + $0x50] sm:$0xff]  }
 0x31a   : > { %v1458_v49 = vrot.slane %v1456_v15, 1  ;;  %v3137_v15 = vld [vmem:[%s3983_s9 + $0xd0] sm:$0xff]  }
 0x31c   : > { %1459 = vrot.lane.b32.xlu0 %v1458_v49, %s3224_s12  ;;  %v3138_v49 = vld [vmem:[%s3983_s9 + $0x10] sm:$0xff]   ;;  %s378_s12 = scalar_lea.vmem [#allocation3], %s377_s19 }
 0x31d   : > { %s2453_s24 = sshll.u32 %s378_s12, 4  ;;  %s3934_s24 = int_to_ptr.vmem [resolvable:$true] %s2453_s24 }
 0x31e   : > { %s3160_s14 = scalar_lea.vmem %s3934_s24, 16  ;;  %p3167_p0 = scmp.lt.s32.totalorder %s3934_s24, %s3165_s15 }
 0x31f   : > { %p3161_p11 = scmp.ne.s32.totalorder %s3934_s24, %s3160_s14  ;;  %p3168_p1 = scmp.lt.s32.totalorder %s3166_s26, %s3160_s14 }
 0x321   : > { %p3162_p12 = pnand %p3161_p11, %p3329_p5  ;;  %p3169_p2 = por %p3168_p1, %p3167_p0 }
 0x323   : > { %p3163_p13 = pneg %p3162_p12 }
 0x325   : > { %p3170_p3 = pnand %p3169_p2, %p3163_p13 }
 0x386   : > { %v1443_v51 = vpop.permute.xlu1 %1442 }
 0x387   : > { %v1463_v55 = vsel %vm542_vm2, %v1437_v39, %v1443_v51  ;;  %v3139_v51 = vld [vmem:[%s3983_s9 + $0x90] sm:$0xff]  }
 0x388   : > { %v1448_v53 = vpop.permute.xlu0 %1447 }
 0x389   : > { %v1467_v23 = vsel %vm542_vm2, %v1445_v13, %v1448_v53  ;;  %v3140_v13 = vld [vmem:[%s3983_s9 + $0x58] sm:$0xff]  }
 0x38a   : > { %1801 = vmatprep.mubr.bf16.mxu0 %v1467_v23  ;;  %v1452_v61 = vpop.permute.xlu1 %1451  ;;  %v3141_v53 = vld [vmem:[%s3983_s9 + $0xd8] sm:$0xff]  }
 0x38b   : > { %1802 = vmatmul.mubr.bf16.vlgmr.msra.gmra.mrb[20].mxu0 %v1463_v55  ;;  %v1471_v59 = vsel %vm542_vm2, %v1449_v57, %v1452_v61  ;;  %v3143_v23 = vld [vmem:[%s3983_s9 + $0x98] sm:$0xff]   ;;  %v3144_v55 = vld [vmem:[%s3983_s9 + $0x60] sm:$0xff]   ;;  %v3148_v57 = vld [vmem:[%s3983_s9 + $0x68] sm:$0xff]  }
 0x38c   : > { %2861 = vmatpush3.bf16.msra.mxu0 %v3098_v54  ;;  %2868 = vmatprep.mubr.msk.bf16.mxu0 %vm3228_vm6, %v3227_v27  ;;  %v3142_v54 = vld [vmem:[%s3983_s9 + $0x18] sm:$0xff]   ;;  %v3146_v61 = vld [vmem:[%s3983_s9 + $0x20] sm:$0xff]  }
 0x38d   : > { %2862 = vmatprep.subr.bf16.mxu0 %v3227_v27 }
 0x38e   : > { %v1460_v52 = vpop.permute.xlu0 %1459 }
 0x38f   : > { %v1475_v58 = vsel %vm542_vm2, %v1454_v38, %v1460_v52  ;;  %v3147_v38 = vld [vmem:[%s3983_s9 + $0xa0] sm:$0xff]   ;;  %v3149_v52 = vld [vmem:[%s3983_s9 + $0xe8] sm:$0xff]  }
 0x390   : > { %2863 = vmatpush3.bf16.msra.mxu0 %v3101_v56  ;;  %1841 = vmatprep.mubr.bf16.mxu1 %v1475_v58  ;;  %v3145_v56 = vld [vmem:[%s3983_s9 + $0xe0] sm:$0xff]   ;;  %v3150_v58 = vld [vmem:[%s3983_s9 + $0x28] sm:$0xff]  }
 0x391   : > { %1842 = vmatmul.mubr.bf16.vlgmr.msra.gmra.mrb[16].mxu1 %v1471_v59  ;;  %2864 = vmatprep.subr.bf16.mxu0 %v3227_v27  ;;  %v3151_v59 = vld [vmem:[%s3983_s9 + $0xa8] sm:$0xff]  }
 0x392   : > { %2054 = vmatpush1.bf16.msra.mxu1 %v3107_v3  ;;  %2085 = vmatprep.mubr.bf16.mxu1 %v3229_v19  ;;  %v3157_v3 = vld [vmem:[%s3983_s9 + $0xf8] sm:$0xff]  }
 0x393   : > { %2055 = vmatprep.subr.bf16.mxu1 %v3115_v60 }
 0x394   : > { %2865 = vmatpush3.bf16.msra.mxu0 %v3102_v62  ;;  %v3152_v62 = vld [vmem:[%s3983_s9 + $0x70] sm:$0xff]  }
 0x395   : > { %2866 = vmatprep.subr.bf16.mxu0 %v3227_v27  ;;  %v1549_v27 = vld [vmem:[%s3980_s6] sm:$0x1] }
 0x396   : > { %2056 = vmatpush1.bf16.msra.mxu1 %v3113_v7 }
 0x397   : > { %2057 = vmatprep.subr.bf16.mxu1 %v3121_v9  ;;  %v1907_v9 = vld [vmem:[%s3982_s8] sm:$0xf] }
 0x398   : > { %2867 = vmatpush3.bf16.msra.mxu0 %v3103_v63  ;;  %v3153_v63 = vld [vmem:[%s3983_s9 + $0xf0] sm:$0xff]  }
 0x399   : > { %2012 = vmatprep.subr.bf16.mxu0 %v3106_v2  ;;  %v3156_v2 = vld [vmem:[%s3983_s9 + $0x78] sm:$0xff]  }
 0x39a   : > { %2058 = vmatpush1.bf16.msra.mxu1 %v3119_v12 }
 0x39b   : > { %2869 = vmatmul.mubr.msk.bf16.vlgmr.msra.gmra.mrb[24].mxu0 %vm542_vm2, %v1461_v0  ;;  %2059 = vmatprep.subr.bf16.mxu1 %v3127_v18  ;;  %v3154_v0 = vld [vmem:[%s3983_s9 + $0x30] sm:$0xff]  }
 0x39c   : > { %2013 = vmatpush1.bf16.msra.mxu0 %v3104_v1  ;;  %2044 = vmatprep.mubr.bf16.mxu0 %v3229_v19  ;;  %v3155_v1 = vld [vmem:[%s3983_s9 + $0xb0] sm:$0xff]  }
 0x39d   : > { %2014 = vmatprep.subr.bf16.mxu0 %v3112_v6  ;;  %v1989_v6 = vlaneseq }
 0x39e   : > { %2060 = vmatpush1.bf16.msra.mxu1 %v3125_v17 }
 0x39f   : > { %2838 = vmatprep.subr.bf16.mxu1 %v3129_v20  ;;  %v1990_v7 = vshrl.u32 %v1989_v6, 7 }
 0x3a0   : > { %2015 = vmatpush1.bf16.msra.mxu0 %v3110_v5  ;;  %v3159_v5 = vld [vmem:[%s3983_s9 + $0xb8] sm:$0xff]  }
 0x3a1   : > { %2016 = vmatprep.subr.bf16.mxu0 %v3118_v8  ;;  %v1991_v60 = vsub.s32 0, %v1990_v7  ;;  %v1999_v8 = vsub.s32 2, %v1990_v7  ;;  %v2003_v12 = vsub.s32 3, %v1990_v7 }
 0x3a3   : > { %v2004_v18 = vrot.slane %v1907_v9, %v2003_v12 }
 0x3a4   : > { %2017 = vmatpush1.bf16.msra.mxu0 %v3116_v11  ;;  %v1995_v11 = vsub.s32 1, %v1990_v7 }
 0x3a5   : > { %2018 = vmatprep.subr.bf16.mxu0 %v3124_v16  ;;  %v2000_v16 = vrot.slane %v1907_v9, %v1999_v8 }
 0x3a6   : > { %v1996_v17 = vrot.slane %v1907_v9, %v1995_v11 }
 0x3a8   : > { %2019 = vmatpush1.bf16.msra.mxu0 %v3122_v14  ;;  %v1992_v14 = vrot.slane %v1907_v9, %v1991_v60 }
 0x3a9   : > { %2816 = vmatprep.subr.bf16.mxu0 %v3128_v10 }
 0x45e   : > { %v2783_v21 = vpop.f32.mrb[20].mxu0 }
 0x45f   : > { %v2784_v24 = vpop.f32.mrb[21].mxu0 }
 0x460   : > { %v2785_v25 = vadd.f32 %v2784_v24, %v2783_v21  ;;  %v2786_v22 = vpop.f32.mrb[22].mxu0 }
 0x461   : > { %v2787_v26 = vpop.f32.mrb[23].mxu0 }
 0x462   : > { %v1804_v30 = vadd.f32 %v2785_v25, %v1549_v27 }
 0x464   : > { %v2805_v28 = vpop.f32.mrb[16].mxu1 }
 0x465   : > { %v2806_v29 = vpop.f32.mrb[17].mxu1 }
 0x466   : > { %v2807_v31 = vadd.f32 %v2806_v29, %v2805_v28  ;;  %v2808_v32 = vpop.f32.mrb[18].mxu1 }
 0x467   : > { %v2809_v33 = vpop.f32.mrb[19].mxu1 }
 0x468   : > { %v1844_v50 = vadd.f32 %v2807_v31, %v1804_v30 }
 0x46e   : > { %v1883_v34 = vpop.f32.mrb[24].mxu0 }
 0x46f   : > { %v1884_v35 = vadd.f32 %v1883_v34, %v1844_v50  ;;  %v2870_v36 = vpop.f32.mrb[25].mxu0 }
 0x470   : > { %v1886_v37 = vpop.f32.mrb[26].mxu0 }
 0x471   : > { %v1889_v39 = vmax.f32 %v1884_v35, 0.0  ;;  %v2871_v40 = vpop.f32.mrb[27].mxu0 }
 0x473   : > { %v1890_v43 = vpack.c.bf16 %v1889_v39, %v1889_v39 }
 0x475   : > { %2628 = vmatmul.mubr.msk.bf16.vlgmr.msra.gmra.mrb[28].mxu0 %vm542_vm2, %v1890_v43  ;;  %2629 = vmatmul.mubr.msk.bf16.vlgmr.msra.gmra.mrb[20].mxu1 %vm542_vm2, %v1890_v43 }
 0x476   : > { %2817 = vmatpush3.bf16.msra.mxu0 %v3130_v41  ;;  %2839 = vmatpush3.bf16.msra.mxu1 %v3131_v42  ;;  %v2166_v41 = vld [vmem:[%s3984_s10] sm:$0x1] }
 0x477   : > { %2818 = vmatprep.subr.bf16.mxu0 %v3132_v44  ;;  %2840 = vmatprep.subr.bf16.mxu1 %v3133_v45 }
 0x47a   : > { %2819 = vmatpush3.bf16.msra.mxu0 %v3134_v46  ;;  %2841 = vmatpush3.bf16.msra.mxu1 %v3135_v47 }
 0x47b   : > { %2820 = vmatprep.subr.bf16.mxu0 %v3136_v48  ;;  %2842 = vmatprep.subr.bf16.mxu1 %v3137_v15 }
 0x47e   : > { %2821 = vmatpush3.bf16.msra.mxu0 %v3138_v49  ;;  %2843 = vmatpush3.bf16.msra.mxu1 %v3139_v51 }
 0x47f   : > { %2822 = vmatprep.subr.bf16.mxu0 %v3140_v13  ;;  %2844 = vmatprep.subr.bf16.mxu1 %v3141_v53 }
 0x482   : > { %2823 = vmatpush3.bf16.msra.mxu0 %v3142_v54  ;;  %2845 = vmatpush3.bf16.msra.mxu1 %v3143_v23 }
 0x483   : > { %2824 = vmatprep.subr.bf16.mxu0 %v3144_v55  ;;  %2846 = vmatprep.subr.bf16.mxu1 %v3145_v56 }
 0x486   : > { %2825 = vmatpush3.bf16.msra.mxu0 %v3146_v61  ;;  %2847 = vmatpush3.bf16.msra.mxu1 %v3147_v38 }
 0x487   : > { %2826 = vmatprep.subr.bf16.mxu0 %v3148_v57  ;;  %2848 = vmatprep.subr.bf16.mxu1 %v3149_v52 }
 0x48a   : > { %2827 = vmatpush3.bf16.msra.mxu0 %v3150_v58  ;;  %2849 = vmatpush3.bf16.msra.mxu1 %v3151_v59 }
 0x48b   : > { %2828 = vmatprep.subr.bf16.mxu0 %v3152_v62  ;;  %2850 = vmatprep.subr.bf16.mxu1 %v3153_v63 }
 0x48e   : > { %2829 = vmatpush3.bf16.msra.mxu0 %v3154_v0  ;;  %2851 = vmatpush3.bf16.msra.mxu1 %v3155_v1 }
 0x48f   : > { %2830 = vmatprep.subr.bf16.mxu0 %v3156_v2  ;;  %2852 = vmatprep.subr.bf16.mxu1 %v3157_v3 }
 0x492   : > { %2831 = vmatpush3.bf16.msra.mxu0 %v3158_v4  ;;  %2853 = vmatpush3.bf16.msra.mxu1 %v3159_v5 }
 0x548   : > { %v2046_v19 = vpop.f32.mrb[28].mxu0  ;;  %v2087_v10 = vpop.f32.mrb[20].mxu1 }
 0x549   : > { %v2047_v20 = vadd.f32 %v2046_v19, %v1992_v14  ;;  %v2088_v21 = vadd.f32 %v2087_v10, %v2000_v16  ;;  %v2048_v24 = vpop.f32.mrb[29].mxu0  ;;  %v2089_v25 = vpop.f32.mrb[21].mxu1 }
 0x54a   : > { %v2049_v22 = vadd.f32 %v2048_v24, %v1996_v17  ;;  %v2090_v26 = vadd.f32 %v2089_v25, %v2004_v18  ;;  %v2050_v27 = vpop.f32.mrb[30].mxu0  ;;  %v2091_v28 = vpop.f32.mrb[22].mxu1 }
 0x54b   : > { %v2094_v29 = vmax.f32 %v2047_v20, 0.0  ;;  %v2096_v30 = vmax.f32 %v2088_v21, 0.0  ;;  %v2051_v31 = vpop.f32.mrb[31].mxu0  ;;  %v2092_v32 = vpop.f32.mrb[23].mxu1 }
 0x54c   : > { %v2095_v33 = vmax.f32 %v2049_v22, 0.0  ;;  %v2097_v50 = vmax.f32 %v2090_v26, 0.0 }
 0x54d   : > { %v2098_v36 = vpack.c.bf16 %v2094_v29, %v2094_v29  ;;  %v2100_v37 = vpack.c.bf16 %v2096_v30, %v2096_v30 }
 0x54e   : > { %v2099_v34 = vpack.c.bf16 %v2095_v33, %v2095_v33  ;;  %v2101_v35 = vpack.c.bf16 %v2097_v50, %v2097_v50 }
 0x550   : > { %2391 = vmatprep.mubr.bf16.mxu0 %v2099_v34  ;;  %2431 = vmatprep.mubr.bf16.mxu1 %v2101_v35 }
 0x551   : > { %2392 = vmatmul.mubr.bf16.vlgmr.msra.gmra.mrb[32].mxu0 %v2098_v36  ;;  %2432 = vmatmul.mubr.bf16.vlgmr.msra.gmra.mrb[24].mxu1 %v2100_v37 }
 0x624   : > { %v2832_v39 = vpop.f32.mrb[32].mxu0  ;;  %v2854_v40 = vpop.f32.mrb[24].mxu1 }
 0x625   : > { %v2833_v42 = vpop.f32.mrb[33].mxu0  ;;  %v2855_v43 = vpop.f32.mrb[25].mxu1 }
 0x626   : > { %v2834_v44 = vadd.f32 %v2833_v42, %v2832_v39  ;;  %v2856_v45 = vadd.f32 %v2855_v43, %v2854_v40  ;;  %v2835_v46 = vpop.f32.mrb[34].mxu0  ;;  %v2857_v47 = vpop.f32.mrb[26].mxu1 }
 0x627   : > { %v2836_v48 = vpop.f32.mrb[35].mxu0  ;;  %v2858_v15 = vpop.f32.mrb[27].mxu1 }
 0x628   : > { %v2394_v49 = vadd.f32 %v2834_v44, %v2166_v41 }
 0x62a   : > { %v2434_v51 = vadd.f32 %v2856_v45, %v2394_v49 }
 0x62c   : > { %2439 = vst [vmem:[%s378_s12] sm:$0x1] %v2434_v51 }
 0x62d   : > { %3173 = shalt.err (!%p3170_p3)
}
 0x62e   : > { %s3174_s19 = scalar_lea.hbm %s3932_s30, 16  ;;  %s3178_s12 = scalar_lea.hbm %s3985_s11, 32 }
 0x62f   : > { %p3175_p4 = scmp.ne.s32.totalorder %s3932_s30, %s3174_s19  ;;  %p3179_p9 = scmp.lt.u32.totalorder %s3932_s30, %s3985_s11 }
 0x630   : > { %p3180_p10 = scmp.lt.u32.totalorder %s3178_s12, %s3174_s19  ;;  %p3182_p12 = scmp.lt.u32.totalorder %s3174_s19, %s3932_s30 }
 0x631   : > { %p3176_p7 = pnand %p3175_p4, %p3329_p5 }
 0x632   : > { %p3181_p11 = por %p3180_p10, %p3179_p9 }
 0x633   : > { %p3177_p8 = pneg %p3176_p7 }
 0x634   : > { %p3183_p13 = por %p3182_p12, %p3181_p11 }
 0x636   : > { %p3184_p0 = pnand %p3183_p13, %p3177_p8 }
 0x638   : > { %3187 = shalt.err (!%p3184_p0)
}
 0x639   : > { %2873 = dma.vmem_to_hbm [thread:$0]  (%p3329_p5), %s3934_s24, 16, %s3932_s30, %s2441_s13  }
 0x63a PF: > { %p2879_p1 = scmp.ge.s32.totalorder %s3222_s20, 2  ;;  %s2465_s14 = sand.u32 1, %s3210_s17  }
 0x63b   : > { %s2466_s21 = scalar_lea.sflag [#allocation4], %s2465_s14 }
 0x63c   : > { %p2876_p2 = pnand %p2879_p1, %p3333_p6 }
 0x63e   : > { %3205 = dma.done.wait (!%p2876_p2), %s2466_s21, 16  }
 0x63f   : > { %3207 = vsyncadd (!%p2876_p2), %s2466_s21, 4294967280  ;;  %s3991_s15 = sld [smem:[#allocation6_spill]]  ;;  %s3992_s19 = sld [smem:[#allocation7_spill]] }
 0x640   : > { %p21_p3 = scmp.ge.s32.totalorder %s3316_s23, 4   ;;  %s3993_s17 = smov %s3214_s18 }
 0x641   : > { %s3995_s20 = smov %s3316_s23 }
 0x642   :  { %23 = sbr.rel (!%p21_p3) target bundleno = 3 (0x3), region = 138 }
 0x645   : > { %s3994_s18 = smov %s3991_s15 }
 0x649   :  { %2470 = vsyncpa [#allocation4], 1 }
 0x64a   :  { %2472 = vsyncpa [#allocation4 + $0x1], 1 }

</bundles_post_ra>
